<compile_context>
chip_gen: v6e
topology: v6e:2x2x1
jax: 0.10.0
libtpu: 0.0.40
codegen_flags: <defaults>
</compile_context>

<pallas_src>
import numpy as np
import jax
import jax.numpy as jnp
from jax import lax
from jax.experimental import pallas as pl

# Problem sizes (small, consistent with the module: ratio must divide C).
B, C, H, W = 2, 16, 16, 16
RATIO = 4
CR = C // RATIO
KSZ = 7
PAD = KSZ // 2            # 3 : spatial-attention halo
CPAD = 1                  # 1 : 3x3-conv halo
WPC = W + 2 * CPAD        # 18: padded width for the 3x3 conv input
BN_EPS = 1e-5

assert C & (C - 1) == 0, "lane-halving channel reduction assumes power-of-two C"
assert C % RATIO == 0


def rescbam_kernel(lhs3_ref, xu_ref, g3_ref, sab_ref, w1_ref, w2_ref,
                   ru_ref, tt_ref, ttT_ref, bns_ref, bnb_ref, o_ref):
    f32 = jnp.float32
    bf16 = jnp.bfloat16

    # ---------- Conv2dReLU branch: 3x3 conv (pad 1) as ONE fused band matmul -> BN -> ReLU
    # lhs3_ref: (B*H, 3*C*WPC) bf16, built in the wrapper (dy slices K-concatenated).
    conv = jnp.dot(lhs3_ref[...], g3_ref[...], preferred_element_type=f32)   # (B*H, C*W)
    out1 = jnp.maximum(conv * bns_ref[...] + bnb_ref[...], 0.0)

    # ---------- Channel attention: global avg/max pool -> shared MLP -> sigmoid
    xu = xu_ref[...]                                      # (B*H, C*W) f32, lane = c*W + w
    xub = xu.reshape(B, H, C * W)
    s1 = jnp.sum(xub, axis=1)                             # (B, C*W)
    m1 = jnp.max(xub, axis=1)
    avg = jnp.sum(s1.reshape(B, C, W), axis=-1) * (1.0 / (H * W))   # (B, C)
    mx = jnp.max(m1.reshape(B, C, W), axis=-1)                       # (B, C)
    p = jnp.concatenate([avg, mx], axis=0).astype(bf16)              # (2B, C): both MLP passes fused
    hdn = jnp.maximum(jnp.dot(p, w1_ref[...], preferred_element_type=f32), 0.0)
    z = jnp.dot(hdn.astype(bf16), w2_ref[...], preferred_element_type=f32)   # (2B, C)
    ca = jax.nn.sigmoid(z[:B] + z[B:])                               # (B, C) f32
    # exact 0/1 broadcast of ca over the W positions of each channel group (single bf16 pass)
    ca_b = jnp.dot(ca.astype(bf16), ru_ref[...], preferred_element_type=f32)  # (B, C*W)
    out_u = (xub * ca_b[:, None, :]).reshape(B * H, C * W)            # (B*H, C*W) f32

    # ---------- Spatial attention
    # sum over channels -> MXU (exact 0/1 matrix); max over channels -> lane-halving chain
    sm = jnp.dot(out_u.astype(bf16), ttT_ref[...], preferred_element_type=f32)  # (B*H, W)
    mm = out_u
    k = C * W
    while k > W:
        k //= 2
        mm = jnp.maximum(mm[..., :k], mm[..., k:])                    # (B*H, W) max over c
    # stack maps lane-adjacent, add the vertical halo as value-level zero rows,
    # and K-concat the 7 dy-shifted slices -> ONE dot for the 7x7 conv.
    maps = jnp.concatenate([sm, mm], axis=-1)                         # (B*H, 2W) f32
    mapsb = maps.reshape(B, H, 2 * W)
    zrows = jnp.zeros((B, PAD, 2 * W), f32)
    mapsp = jnp.concatenate([zrows, mapsb, zrows], axis=1)            # (B, H+2*PAD, 2W)
    sa_lhs = jnp.concatenate([mapsp[:, dy:dy + H, :] for dy in range(KSZ)], axis=-1)
    sa_lhs = sa_lhs.reshape(B * H, KSZ * 2 * W).astype(bf16)          # (B*H, 14W)
    sa = jax.nn.sigmoid(jnp.dot(sa_lhs, sab_ref[...], preferred_element_type=f32))  # (B*H, W)
    # exact 0/1 broadcast of sa over the C channel groups (single bf16 pass)
    sa_b = jnp.dot(sa.astype(bf16), tt_ref[...], preferred_element_type=f32)  # (B*H, C*W)

    o_ref[...] = (out1 + out_u * sa_b).astype(o_ref.dtype)


def prepare_params(w3, w1t, w2t, wsa_flat, bn_scale_vec, bn_bias_vec):
    """One-time weight preprocessing: expand convs into fused band matrices (c-major packing)."""
    # 3x3 conv: (3*C*WPC, C*W); row = dy*C*WPC + ci*WPC + (w+dx), col = co*W + w
    w3r = np.asarray(w3, np.float32).reshape(3, 3, C, C)          # [dy, dx, cin, cout]
    g3 = np.zeros((3, C * WPC, C * W), np.float32)
    ci = np.arange(C)[:, None]
    co = np.arange(C)[None, :]
    for dy in range(3):
        for dx in range(3):
            for w in range(W):
                g3[dy, ci * WPC + (w + dx), co * W + w] = w3r[dy, dx]
    g3 = g3.reshape(3 * C * WPC, C * W)

    # 7x7 SA conv: (KSZ*2*W, W); dx halo absorbed (out-of-range taps dropped = zero pad)
    wsa = np.asarray(wsa_flat, np.float32).reshape(2, KSZ, KSZ)   # [avg/max, dy, dx]
    sab = np.zeros((KSZ, 2, W, W), np.float32)                    # [dy, map, w_in, w_out]
    for dy in range(KSZ):
        for dx in range(KSZ):
            for w in range(W):
                win = w + dx - PAD
                if 0 <= win < W:
                    sab[dy, 0, win, w] = wsa[0, dy, dx] / C       # avg map (sum/C folded here)
                    sab[dy, 1, win, w] = wsa[1, dy, dx]           # max map
    sab = sab.reshape(KSZ * 2 * W, W)

    ru = np.repeat(np.eye(C, dtype=np.float32), W, axis=1)        # (C, C*W): ru[c, c*W+w] = 1
    tt = np.tile(np.eye(W, dtype=np.float32), (1, C))             # (W, C*W): tt[w, c*W+w] = 1
    ttT = np.ascontiguousarray(tt.T)                              # (C*W, W): sum-over-C matrix
    bns = np.repeat(np.asarray(bn_scale_vec, np.float32), W)[None, :]
    bnb = np.repeat(np.asarray(bn_bias_vec, np.float32), W)[None, :]

    bf = jnp.bfloat16
    return (jnp.asarray(g3, bf), jnp.asarray(sab, bf),
            jnp.asarray(w1t, bf), jnp.asarray(w2t, bf),
            jnp.asarray(ru, bf), jnp.asarray(tt, bf), jnp.asarray(ttT, bf),
            jnp.asarray(bns, jnp.float32), jnp.asarray(bnb, jnp.float32))


@jax.jit
def rescbam_forward(x_nchw, params):
    g3, sab, w1t, w2t, ru, tt, ttT, bns, bnb = params
    # c-major lane packing (lane = c*W + w), batch pre-stacked onto the sublane axis.
    xu = jnp.transpose(x_nchw, (0, 2, 1, 3)).reshape(B * H, C * W)
    # conv LHS built in the wrapper: pad, transpose, K-concat the 3 dy-shifted slices, bf16.
    xpad = jnp.pad(x_nchw, ((0, 0), (0, 0), (CPAD, CPAD), (CPAD, CPAD)))
    xp = jnp.transpose(xpad, (0, 2, 1, 3)).reshape(B, H + 2 * CPAD, C * WPC)
    lhs3 = jnp.concatenate([xp[:, dy:dy + H, :] for dy in range(3)], axis=-1)
    lhs3 = lhs3.reshape(B * H, 3 * C * WPC).astype(jnp.bfloat16)

    y = pl.pallas_call(
        rescbam_kernel,
        out_shape=jax.ShapeDtypeStruct((B * H, C * W), x_nchw.dtype),
        grid=(1,),
        in_specs=[
            pl.BlockSpec((B * H, 3 * C * WPC), lambda i: (0, 0)),
            pl.BlockSpec((B * H, C * W), lambda i: (0, 0)),
            pl.BlockSpec((3 * C * WPC, C * W), lambda i: (0, 0)),
            pl.BlockSpec((KSZ * 2 * W, W), lambda i: (0, 0)),
            pl.BlockSpec((C, CR), lambda i: (0, 0)),
            pl.BlockSpec((CR, C), lambda i: (0, 0)),
            pl.BlockSpec((C, C * W), lambda i: (0, 0)),
            pl.BlockSpec((W, C * W), lambda i: (0, 0)),
            pl.BlockSpec((C * W, W), lambda i: (0, 0)),
            pl.BlockSpec((1, C * W), lambda i: (0, 0)),
            pl.BlockSpec((1, C * W), lambda i: (0, 0)),
        ],
        out_specs=pl.BlockSpec((B * H, C * W), lambda i: (0, 0)),
    )(lhs3, xu, g3, sab, w1t, w2t, ru, tt, ttT, bns, bnb)

    return jnp.transpose(y.reshape(B, H, C, W), (0, 2, 1, 3))     # back to NCHW


def reference(x, w3, w1t, w2t, bn_scale_vec, bn_bias_vec, wsa_flat):
    """Pure-JAX mirror of the PyTorch forward (f32, HIGHEST) for validation."""
    prec = lax.Precision.HIGHEST
    w3_hwio = w3.reshape(3, 3, C, C)
    w3_oihw = jnp.transpose(w3_hwio, (3, 2, 0, 1))
    conv = lax.conv_general_dilated(x, w3_oihw, (1, 1), ((1, 1), (1, 1)),
                                    dimension_numbers=("NCHW", "OIHW", "NCHW"),
                                    precision=prec)
    bn = conv * bn_scale_vec.reshape(1, C, 1, 1) + bn_bias_vec.reshape(1, C, 1, 1)
    out1 = jnp.maximum(bn, 0.0)
    avg = jnp.mean(x, axis=(2, 3))
    mx = jnp.max(x, axis=(2, 3))
    mlp = lambda v: jnp.dot(jnp.maximum(jnp.dot(v, w1t, precision=prec), 0.0),
                            w2t, precision=prec)
    ca = jax.nn.sigmoid(mlp(avg) + mlp(mx))
    out = x * ca[:, :, None, None]
    avg_s = jnp.mean(out, axis=1, keepdims=True)
    max_s = jnp.max(out, axis=1, keepdims=True)
    cat = jnp.concatenate([avg_s, max_s], axis=1)
    wsa = wsa_flat.reshape(1, 2, KSZ, KSZ)
    sconv = lax.conv_general_dilated(cat, wsa, (1, 1), ((PAD, PAD), (PAD, PAD)),
                                     dimension_numbers=("NCHW", "OIHW", "NCHW"),
                                     precision=prec)
    sa = jax.nn.sigmoid(sconv)
    return out1 + out * sa


if __name__ == "__main__":
    key = jax.random.PRNGKey(0)
    k1, k2, k3, k4, k5, k6, k7, kx = jax.random.split(key, 8)

    # Deterministic synthetic parameters (shapes from the module's __init__).
    w3 = 0.1 * jax.random.normal(k1, (9, C, C), jnp.float32)        # (tap, Cin, Cout)
    w1t = 0.2 * jax.random.normal(k2, (C, CR), jnp.float32)         # CA mlp conv1 (transposed)
    w2t = 0.2 * jax.random.normal(k3, (CR, C), jnp.float32)         # CA mlp conv2 (transposed)
    wsa_flat = 0.1 * jax.random.normal(k4, (2 * KSZ * KSZ,), jnp.float32)  # SA 7x7 conv (1,2,7,7)
    gamma = 1.0 + 0.1 * jax.random.normal(k5, (C,), jnp.float32)
    beta = 0.1 * jax.random.normal(k6, (C,), jnp.float32)
    run_mean = 0.1 * jax.random.normal(k7, (C,), jnp.float32)
    run_var = jnp.ones((C,), jnp.float32)
    inv_std = gamma / jnp.sqrt(run_var + BN_EPS)
    bn_scale = inv_std                                              # (C,)
    bn_bias = beta - run_mean * inv_std                             # (C,)

    x = jax.random.normal(kx, (B, C, H, W), jnp.float32)

    params = prepare_params(w3, w1t, w2t, wsa_flat, bn_scale, bn_bias)
    y = jax.block_until_ready(rescbam_forward(x, params))
    y_ref = reference(x, w3, w1t, w2t, bn_scale, bn_bias, wsa_flat)

    err = float(jnp.max(jnp.abs(y - y_ref)))
    assert y.shape == (B, C, H, W), y.shape
    # bf16 matmul operands (f32 accumulation) on the conv/broadcast paths -> small drift
    # vs the f32/HIGHEST reference; ~1-2% of the output magnitude.
    assert err < 1e-1, f"max abs err vs reference: {err}"
    print("KERNEL_OK")
</pallas_src>

<mosaic_0001>
module attributes {stable_mosaic.version = 11 : i64} {
  func.func @rescbam_kernel(%arg0: i32, %arg1: memref<32x864xbf16, #tpu.memory_space<vmem>>, %arg2: memref<32x256xf32, #tpu.memory_space<vmem>>, %arg3: memref<864x256xbf16, #tpu.memory_space<vmem>>, %arg4: memref<224x16xbf16, #tpu.memory_space<vmem>>, %arg5: memref<16x4xbf16, #tpu.memory_space<vmem>>, %arg6: memref<4x16xbf16, #tpu.memory_space<vmem>>, %arg7: memref<16x256xbf16, #tpu.memory_space<vmem>>, %arg8: memref<16x256xbf16, #tpu.memory_space<vmem>>, %arg9: memref<256x16xbf16, #tpu.memory_space<vmem>>, %arg10: memref<1x256xf32, #tpu.memory_space<vmem>>, %arg11: memref<1x256xf32, #tpu.memory_space<vmem>>, %arg12: memref<32x256xf32, #tpu.memory_space<vmem>>) attributes {dimension_semantics = [#tpu.dimension_semantics<arbitrary>], iteration_bounds = array<i64: 1>, scalar_prefetch = 0 : i64, scratch_operands = 0 : i64, tpu.core_type = #tpu.core_type<tc>, window_params = [{pipeline_mode = #tpu.pipeline_mode<synchronous>, transform_indices = @transform_0, window_bounds = array<i64: 32, 864>}, {pipeline_mode = #tpu.pipeline_mode<synchronous>, transform_indices = @transform_1, window_bounds = array<i64: 32, 256>}, {pipeline_mode = #tpu.pipeline_mode<synchronous>, transform_indices = @transform_2, window_bounds = array<i64: 864, 256>}, {pipeline_mode = #tpu.pipeline_mode<synchronous>, transform_indices = @transform_3, window_bounds = array<i64: 224, 16>}, {pipeline_mode = #tpu.pipeline_mode<synchronous>, transform_indices = @transform_4, window_bounds = array<i64: 16, 4>}, {pipeline_mode = #tpu.pipeline_mode<synchronous>, transform_indices = @transform_5, window_bounds = array<i64: 4, 16>}, {pipeline_mode = #tpu.pipeline_mode<synchronous>, transform_indices = @transform_6, window_bounds = array<i64: 16, 256>}, {pipeline_mode = #tpu.pipeline_mode<synchronous>, transform_indices = @transform_7, window_bounds = array<i64: 16, 256>}, {pipeline_mode = #tpu.pipeline_mode<synchronous>, transform_indices = @transform_8, window_bounds = array<i64: 256, 16>}, {pipeline_mode = #tpu.pipeline_mode<synchronous>, transform_indices = @transform_9, window_bounds = array<i64: 1, 256>}, {pipeline_mode = #tpu.pipeline_mode<synchronous>, transform_indices = @transform_10, window_bounds = array<i64: 1, 256>}, {pipeline_mode = #tpu.pipeline_mode<synchronous>, transform_indices = @transform_11, window_bounds = array<i64: 32, 256>}]} {
    %c0 = arith.constant 0 : index
    %c0_0 = arith.constant 0 : index
    %0 = vector.load %arg1[%c0, %c0_0] : memref<32x864xbf16, #tpu.memory_space<vmem>>, vector<32x864xbf16>
    %c0_1 = arith.constant 0 : index
    %c0_2 = arith.constant 0 : index
    %1 = vector.load %arg3[%c0_1, %c0_2] : memref<864x256xbf16, #tpu.memory_space<vmem>>, vector<864x256xbf16>
    %cst = arith.constant dense<0.000000e+00> : vector<32x256xf32>
    %2 = tpu.matmul %0, %1, %cst {dimension_numbers = #tpu.dot_dimension_numbers<[1], [0], [0], [1], [0, 0, 1, 1], [], []>} : vector<32x864xbf16>, vector<864x256xbf16>, vector<32x256xf32> -> vector<32x256xf32>
    %c0_3 = arith.constant 0 : index
    %c0_4 = arith.constant 0 : index
    %3 = vector.load %arg10[%c0_3, %c0_4] : memref<1x256xf32, #tpu.memory_space<vmem>>, vector<1x256xf32>
    %4 = vector.broadcast %3 : vector<1x256xf32> to vector<32x256xf32>
    %5 = arith.mulf %2, %4 : vector<32x256xf32>
    %c0_5 = arith.constant 0 : index
    %c0_6 = arith.constant 0 : index
    %6 = vector.load %arg11[%c0_5, %c0_6] : memref<1x256xf32, #tpu.memory_space<vmem>>, vector<1x256xf32>
    %7 = vector.broadcast %6 : vector<1x256xf32> to vector<32x256xf32>
    %8 = arith.addf %5, %7 : vector<32x256xf32>
    %cst_7 = arith.constant 0.000000e+00 : f32
    %9 = vector.broadcast %cst_7 : f32 to vector<32x256xf32>
    %10 = arith.maximumf %8, %9 : vector<32x256xf32>
    %c0_8 = arith.constant 0 : index
    %c0_9 = arith.constant 0 : index
    %11 = vector.load %arg2[%c0_8, %c0_9] : memref<32x256xf32, #tpu.memory_space<vmem>>, vector<32x256xf32>
    %12 = vector.shape_cast %11 : vector<32x256xf32> to vector<2x16x256xf32>
    %cst_10 = arith.constant dense<0.000000e+00> : vector<2x256xf32>
    %13 = vector.multi_reduction <add>, %12, %cst_10 [1] : vector<2x16x256xf32> to vector<2x256xf32>
    %cst_11 = arith.constant dense<0xFF800000> : vector<2x256xf32>
    %14 = vector.multi_reduction <maximumf>, %12, %cst_11 [1] : vector<2x16x256xf32> to vector<2x256xf32>
    %15 = vector.shape_cast %13 : vector<2x256xf32> to vector<2x16x16xf32>
    %cst_12 = arith.constant dense<0.000000e+00> : vector<2x16xf32>
    %16 = vector.multi_reduction <add>, %15, %cst_12 [2] : vector<2x16x16xf32> to vector<2x16xf32>
    %cst_13 = arith.constant 3.906250e-03 : f32
    %17 = vector.broadcast %cst_13 : f32 to vector<2x16xf32>
    %18 = arith.mulf %16, %17 : vector<2x16xf32>
    %19 = vector.shape_cast %14 : vector<2x256xf32> to vector<2x16x16xf32>
    %cst_14 = arith.constant dense<0xFF800000> : vector<2x16xf32>
    %20 = vector.multi_reduction <maximumf>, %19, %cst_14 [2] : vector<2x16x16xf32> to vector<2x16xf32>
    %21 = tpu.concatenate %18, %20 in 0 : vector<2x16xf32>, vector<2x16xf32> -> vector<4x16xf32>
    %22 = arith.truncf %21 : vector<4x16xf32> to vector<4x16xbf16>
    %c0_15 = arith.constant 0 : index
    %c0_16 = arith.constant 0 : index
    %23 = vector.load %arg5[%c0_15, %c0_16] : memref<16x4xbf16, #tpu.memory_space<vmem>>, vector<16x4xbf16>
    %cst_17 = arith.constant dense<0.000000e+00> : vector<4x4xf32>
    %24 = tpu.matmul %22, %23, %cst_17 {dimension_numbers = #tpu.dot_dimension_numbers<[1], [0], [0], [1], [0, 0, 1, 1], [], []>} : vector<4x16xbf16>, vector<16x4xbf16>, vector<4x4xf32> -> vector<4x4xf32>
    %cst_18 = arith.constant 0.000000e+00 : f32
    %25 = vector.broadcast %cst_18 : f32 to vector<4x4xf32>
    %26 = arith.maximumf %24, %25 : vector<4x4xf32>
    %27 = arith.truncf %26 : vector<4x4xf32> to vector<4x4xbf16>
    %c0_19 = arith.constant 0 : index
    %c0_20 = arith.constant 0 : index
    %28 = vector.load %arg6[%c0_19, %c0_20] : memref<4x16xbf16, #tpu.memory_space<vmem>>, vector<4x16xbf16>
    %cst_21 = arith.constant dense<0.000000e+00> : vector<4x16xf32>
    %29 = tpu.matmul %27, %28, %cst_21 {dimension_numbers = #tpu.dot_dimension_numbers<[1], [0], [0], [1], [0, 0, 1, 1], [], []>} : vector<4x4xbf16>, vector<4x16xbf16>, vector<4x16xf32> -> vector<4x16xf32>
    %30 = vector.extract_strided_slice %29 {offsets = [0, 0], sizes = [2, 16], strides = [1, 1]} : vector<4x16xf32> to vector<2x16xf32>
    %31 = vector.extract_strided_slice %29 {offsets = [2, 0], sizes = [2, 16], strides = [1, 1]} : vector<4x16xf32> to vector<2x16xf32>
    %32 = arith.addf %30, %31 : vector<2x16xf32>
    %33 = arith.negf %32 : vector<2x16xf32>
    %34 = math.exp %33 : vector<2x16xf32>
    %cst_22 = arith.constant 1.000000e+00 : f32
    %35 = vector.broadcast %cst_22 : f32 to vector<2x16xf32>
    %36 = arith.addf %35, %34 : vector<2x16xf32>
    %37 = arith.divf %35, %36 : vector<2x16xf32>
    %38 = arith.truncf %37 : vector<2x16xf32> to vector<2x16xbf16>
    %c0_23 = arith.constant 0 : index
    %c0_24 = arith.constant 0 : index
    %39 = vector.load %arg7[%c0_23, %c0_24] : memref<16x256xbf16, #tpu.memory_space<vmem>>, vector<16x256xbf16>
    %cst_25 = arith.constant dense<0.000000e+00> : vector<2x256xf32>
    %40 = tpu.matmul %38, %39, %cst_25 {dimension_numbers = #tpu.dot_dimension_numbers<[1], [0], [0], [1], [0, 0, 1, 1], [], []>} : vector<2x16xbf16>, vector<16x256xbf16>, vector<2x256xf32> -> vector<2x256xf32>
    %41 = vector.shape_cast %40 : vector<2x256xf32> to vector<2x1x256xf32>
    %42 = vector.broadcast %41 : vector<2x1x256xf32> to vector<2x16x256xf32>
    %43 = arith.mulf %12, %42 : vector<2x16x256xf32>
    %44 = vector.shape_cast %43 : vector<2x16x256xf32> to vector<32x256xf32>
    %45 = arith.truncf %44 : vector<32x256xf32> to vector<32x256xbf16>
    %c0_26 = arith.constant 0 : index
    %c0_27 = arith.constant 0 : index
    %46 = vector.load %arg9[%c0_26, %c0_27] : memref<256x16xbf16, #tpu.memory_space<vmem>>, vector<256x16xbf16>
    %cst_28 = arith.constant dense<0.000000e+00> : vector<32x16xf32>
    %47 = tpu.matmul %45, %46, %cst_28 {dimension_numbers = #tpu.dot_dimension_numbers<[1], [0], [0], [1], [0, 0, 1, 1], [], []>} : vector<32x256xbf16>, vector<256x16xbf16>, vector<32x16xf32> -> vector<32x16xf32>
    %48 = vector.extract_strided_slice %44 {offsets = [0, 0], sizes = [32, 128], strides = [1, 1]} : vector<32x256xf32> to vector<32x128xf32>
    %49 = vector.extract_strided_slice %44 {offsets = [0, 128], sizes = [32, 128], strides = [1, 1]} : vector<32x256xf32> to vector<32x128xf32>
    %50 = arith.maximumf %48, %49 : vector<32x128xf32>
    %51 = vector.extract_strided_slice %50 {offsets = [0, 0], sizes = [32, 64], strides = [1, 1]} : vector<32x128xf32> to vector<32x64xf32>
    %52 = vector.extract_strided_slice %50 {offsets = [0, 64], sizes = [32, 64], strides = [1, 1]} : vector<32x128xf32> to vector<32x64xf32>
    %53 = arith.maximumf %51, %52 : vector<32x64xf32>
    %54 = vector.extract_strided_slice %53 {offsets = [0, 0], sizes = [32, 32], strides = [1, 1]} : vector<32x64xf32> to vector<32x32xf32>
    %55 = vector.extract_strided_slice %53 {offsets = [0, 32], sizes = [32, 32], strides = [1, 1]} : vector<32x64xf32> to vector<32x32xf32>
    %56 = arith.maximumf %54, %55 : vector<32x32xf32>
    %57 = vector.extract_strided_slice %56 {offsets = [0, 0], sizes = [32, 16], strides = [1, 1]} : vector<32x32xf32> to vector<32x16xf32>
    %58 = vector.extract_strided_slice %56 {offsets = [0, 16], sizes = [32, 16], strides = [1, 1]} : vector<32x32xf32> to vector<32x16xf32>
    %59 = arith.maximumf %57, %58 : vector<32x16xf32>
    %60 = tpu.concatenate %47, %59 in 1 : vector<32x16xf32>, vector<32x16xf32> -> vector<32x32xf32>
    %61 = vector.shape_cast %60 : vector<32x32xf32> to vector<2x16x32xf32>
    %cst_29 = arith.constant 0.000000e+00 : f32
    %62 = vector.broadcast %cst_29 : f32 to vector<2x3x32xf32>
    %63 = tpu.concatenate %62, %61, %62 in 1 : vector<2x3x32xf32>, vector<2x16x32xf32>, vector<2x3x32xf32> -> vector<2x22x32xf32>
    %64 = vector.extract_strided_slice %63 {offsets = [0, 0, 0], sizes = [2, 16, 32], strides = [1, 1, 1]} : vector<2x22x32xf32> to vector<2x16x32xf32>
    %65 = vector.extract_strided_slice %63 {offsets = [0, 1, 0], sizes = [2, 16, 32], strides = [1, 1, 1]} : vector<2x22x32xf32> to vector<2x16x32xf32>
    %66 = vector.extract_strided_slice %63 {offsets = [0, 2, 0], sizes = [2, 16, 32], strides = [1, 1, 1]} : vector<2x22x32xf32> to vector<2x16x32xf32>
    %67 = vector.extract_strided_slice %63 {offsets = [0, 3, 0], sizes = [2, 16, 32], strides = [1, 1, 1]} : vector<2x22x32xf32> to vector<2x16x32xf32>
    %68 = vector.extract_strided_slice %63 {offsets = [0, 4, 0], sizes = [2, 16, 32], strides = [1, 1, 1]} : vector<2x22x32xf32> to vector<2x16x32xf32>
    %69 = vector.extract_strided_slice %63 {offsets = [0, 5, 0], sizes = [2, 16, 32], strides = [1, 1, 1]} : vector<2x22x32xf32> to vector<2x16x32xf32>
    %70 = vector.extract_strided_slice %63 {offsets = [0, 6, 0], sizes = [2, 16, 32], strides = [1, 1, 1]} : vector<2x22x32xf32> to vector<2x16x32xf32>
    %71 = tpu.concatenate %64, %65, %66, %67, %68, %69, %70 in 2 : vector<2x16x32xf32>, vector<2x16x32xf32>, vector<2x16x32xf32>, vector<2x16x32xf32>, vector<2x16x32xf32>, vector<2x16x32xf32>, vector<2x16x32xf32> -> vector<2x16x224xf32>
    %72 = vector.shape_cast %71 : vector<2x16x224xf32> to vector<32x224xf32>
    %73 = arith.truncf %72 : vector<32x224xf32> to vector<32x224xbf16>
    %c0_30 = arith.constant 0 : index
    %c0_31 = arith.constant 0 : index
    %74 = vector.load %arg4[%c0_30, %c0_31] : memref<224x16xbf16, #tpu.memory_space<vmem>>, vector<224x16xbf16>
    %cst_32 = arith.constant dense<0.000000e+00> : vector<32x16xf32>
    %75 = tpu.matmul %73, %74, %cst_32 {dimension_numbers = #tpu.dot_dimension_numbers<[1], [0], [0], [1], [0, 0, 1, 1], [], []>} : vector<32x224xbf16>, vector<224x16xbf16>, vector<32x16xf32> -> vector<32x16xf32>
    %76 = arith.negf %75 : vector<32x16xf32>
    %77 = math.exp %76 : vector<32x16xf32>
    %cst_33 = arith.constant 1.000000e+00 : f32
    %78 = vector.broadcast %cst_33 : f32 to vector<32x16xf32>
    %79 = arith.addf %78, %77 : vector<32x16xf32>
    %80 = arith.divf %78, %79 : vector<32x16xf32>
    %81 = arith.truncf %80 : vector<32x16xf32> to vector<32x16xbf16>
    %c0_34 = arith.constant 0 : index
    %c0_35 = arith.constant 0 : index
    %82 = vector.load %arg8[%c0_34, %c0_35] : memref<16x256xbf16, #tpu.memory_space<vmem>>, vector<16x256xbf16>
    %cst_36 = arith.constant dense<0.000000e+00> : vector<32x256xf32>
    %83 = tpu.matmul %81, %82, %cst_36 {dimension_numbers = #tpu.dot_dimension_numbers<[1], [0], [0], [1], [0, 0, 1, 1], [], []>} : vector<32x16xbf16>, vector<16x256xbf16>, vector<32x256xf32> -> vector<32x256xf32>
    %84 = arith.mulf %44, %83 : vector<32x256xf32>
    %85 = arith.addf %10, %84 : vector<32x256xf32>
    %c0_37 = arith.constant 0 : index
    %c0_38 = arith.constant 0 : index
    %86 = vector.load %arg12[%c0_37, %c0_38] : memref<32x256xf32, #tpu.memory_space<vmem>>, vector<32x256xf32>
    tpu.vector_store %arg12[%c0_37, %c0_38], %85 {strides = array<i32>} : memref<32x256xf32, #tpu.memory_space<vmem>>, vector<32x256xf32>,
    return
  }
  func.func @transform_0(%arg0: i32) -> (i32, i32) {
    %c0_i32 = arith.constant 0 : i32
    %c0_i32_0 = arith.constant 0 : i32
    %c0_i32_1 = arith.constant 0 : i32
    return %c0_i32, %c0_i32_0 : i32, i32
  }
  func.func @transform_1(%arg0: i32) -> (i32, i32) {
    %c0_i32 = arith.constant 0 : i32
    %c0_i32_0 = arith.constant 0 : i32
    %c0_i32_1 = arith.constant 0 : i32
    return %c0_i32, %c0_i32_0 : i32, i32
  }
  func.func @transform_2(%arg0: i32) -> (i32, i32) {
    %c0_i32 = arith.constant 0 : i32
    %c0_i32_0 = arith.constant 0 : i32
    %c0_i32_1 = arith.constant 0 : i32
    return %c0_i32, %c0_i32_0 : i32, i32
  }
  func.func @transform_3(%arg0: i32) -> (i32, i32) {
    %c0_i32 = arith.constant 0 : i32
    %c0_i32_0 = arith.constant 0 : i32
    %c0_i32_1 = arith.constant 0 : i32
    return %c0_i32, %c0_i32_0 : i32, i32
  }
  func.func @transform_4(%arg0: i32) -> (i32, i32) {
    %c0_i32 = arith.constant 0 : i32
    %c0_i32_0 = arith.constant 0 : i32
    %c0_i32_1 = arith.constant 0 : i32
    return %c0_i32, %c0_i32_0 : i32, i32
  }
  func.func @transform_5(%arg0: i32) -> (i32, i32) {
    %c0_i32 = arith.constant 0 : i32
    %c0_i32_0 = arith.constant 0 : i32
    %c0_i32_1 = arith.constant 0 : i32
    return %c0_i32, %c0_i32_0 : i32, i32
  }
  func.func @transform_6(%arg0: i32) -> (i32, i32) {
    %c0_i32 = arith.constant 0 : i32
    %c0_i32_0 = arith.constant 0 : i32
    %c0_i32_1 = arith.constant 0 : i32
    return %c0_i32, %c0_i32_0 : i32, i32
  }
  func.func @transform_7(%arg0: i32) -> (i32, i32) {
    %c0_i32 = arith.constant 0 : i32
    %c0_i32_0 = arith.constant 0 : i32
    %c0_i32_1 = arith.constant 0 : i32
    return %c0_i32, %c0_i32_0 : i32, i32
  }
  func.func @transform_8(%arg0: i32) -> (i32, i32) {
    %c0_i32 = arith.constant 0 : i32
    %c0_i32_0 = arith.constant 0 : i32
    %c0_i32_1 = arith.constant 0 : i32
    return %c0_i32, %c0_i32_0 : i32, i32
  }
  func.func @transform_9(%arg0: i32) -> (i32, i32) {
    %c0_i32 = arith.constant 0 : i32
    %c0_i32_0 = arith.constant 0 : i32
    %c0_i32_1 = arith.constant 0 : i32
    return %c0_i32, %c0_i32_0 : i32, i32
  }
  func.func @transform_10(%arg0: i32) -> (i32, i32) {
    %c0_i32 = arith.constant 0 : i32
    %c0_i32_0 = arith.constant 0 : i32
    %c0_i32_1 = arith.constant 0 : i32
    return %c0_i32, %c0_i32_0 : i32, i32
  }
  func.func @transform_11(%arg0: i32) -> (i32, i32) {
    %c0_i32 = arith.constant 0 : i32
    %c0_i32_0 = arith.constant 0 : i32
    %c0_i32_1 = arith.constant 0 : i32
    return %c0_i32, %c0_i32_0 : i32, i32
  }
}

</mosaic_0001>

<bundles_post_ra>
// kernel: rescbam_forward.1
= control target key start
LH: loop header
LB: loop body
LE: loop exit
PB: predicated region body
PF: predicated region fallthrough
CT: control target
= control target key end

     0   :  { %s3128_s29 = smov 80   ;;  %s3129_s30 = smov 112   ;;  %vm1165_vm0 = vcmask 1041409   ;;  %vm1313_vm1 = vcmask 130048   ;;  %vm773_vm2 = vcmask 785408   ;;  %vm3139_vm3 = vmmov 0   ;;  %s4247_s1 = inlined_call_operand.vmem [shape: f32[32,256], index: 1, kind: input, shape index: {}]   ;;  %s4248_s2 = inlined_call_operand.vmem [shape: bf16[864,256], index: 2, kind: input, shape index: {}]   ;;  %s4249_s0 = inlined_call_operand.vmem [shape: bf16[32,864], index: 0, kind: input, shape index: {}]   ;;  %s4250_s4 = inlined_call_operand.vmem [shape: bf16[16,4], index: 4, kind: input, shape index: {}]   ;;  %s4251_s5 = inlined_call_operand.vmem [shape: bf16[4,16], index: 5, kind: input, shape index: {}]   ;;  %s4252_s6 = inlined_call_operand.vmem [shape: bf16[16,256], index: 6, kind: input, shape index: {}]   ;;  %s4253_s8 = inlined_call_operand.vmem [shape: bf16[256,16], index: 8, kind: input, shape index: {}]   ;;  %s4254_s3 = inlined_call_operand.vmem [shape: bf16[224,16], index: 3, kind: input, shape index: {}]   ;;  %s4255_s7 = inlined_call_operand.vmem [shape: bf16[16,256], index: 7, kind: input, shape index: {}]   ;;  %s4256_s9 = inlined_call_operand.vmem [shape: f32[1,256], index: 9, kind: input, shape index: {}]   ;;  %s4257_s10 = inlined_call_operand.vmem [shape: f32[1,256], index: 10, kind: input, shape index: {}]   ;;  %s4258_s11 = inlined_call_operand.vmem [shape: f32[32,256], index: 11, kind: output, shape index: {}]  }
   0x1   :  { %v1044_v0 = vld [vmem:[%s4247_s1 + $0x20] sm:$0xff]  ;;  %v1046_v1 = vld [vmem:[%s4247_s1 + $0x30] sm:$0xff]  ;;  %v3210_v2 = vld [vmem:[%s4247_s1 + $0x28] sm:$0xff]  ;;  %s3130_s16 = smov 64   ;;  %s3131_s17 = smov 96   ;;  %vm1565_vm4 = vcmask 130112  }
   0x2   :  { %v1062_v3 = vadd.f32 %v1046_v1, %v1044_v0  ;;  %v3215_v4 = vld [vmem:[%s4247_s1 + $0x38] sm:$0xff]  ;;  %v3220_v5 = vld [vmem:[%s4247_s1] sm:$0xff]  ;;  %v3225_v6 = vld [vmem:[%s4247_s1 + $0x10] sm:$0xff]  ;;  %s3132_s18 = smov 32   ;;  %s3133_s19 = smov 48   ;;  %v1090_v37 = vmax.f32 %v1044_v0, %v1046_v1  ;;  %vm1600_vm5 = vcmask 1043459  }
   0x3   :  { %v1069_v7 = vadd.f32 %v3215_v4, %v3210_v2  ;;  %v1048_v9 = vadd.f32 %v3225_v6, %v3220_v5  ;;  %v3236_v22 = vld [vmem:[%s4247_s1 + $0x8] sm:$0xff]  ;;  %v3241_v23 = vld [vmem:[%s4247_s1 + $0x18] sm:$0xff]  ;;  %s3134_s20 = smov 16   ;;  %v1097_v44 = vmax.f32 %v3210_v2, %v3215_v4  ;;  %v1076_v45 = vmax.f32 %v3220_v5, %v3225_v6 }
   0x4   :  { %v1063_v8 = vrot.slane %v1062_v3, 4  ;;  %v1055_v26 = vadd.f32 %v3241_v23, %v3236_v22  ;;  %v1091_v41 = vrot.slane %v1090_v37, 4  ;;  %v1083_v58 = vmax.f32 %v3236_v22, %v3241_v23  ;;  %v2881_v5 = vld [vmem:[%s4248_s2 + $0x74] ss:$8 sps:$4 sm:$0xff]   ;;  %v2883_v6 = vld [vmem:[%s4248_s2 + $0x70] ss:$8 sps:$4 sm:$0xff]  }
   0x5   :  { %v1070_v10 = vrot.slane %v1069_v7, 4  ;;  %v1049_v14 = vrot.slane %v1048_v9, 4  ;;  %v1098_v47 = vrot.slane %v1097_v44, 4  ;;  %v1077_v48 = vrot.slane %v1076_v45, 4  ;;  %780 = vmatprep.subr.bf16.mxu0 %v2881_v5  ;;  %v2902_v22 = vld [vmem:[%s4248_s2 + $0x4] ss:$8 sps:$4 sm:$0xff]  }
   0x6   :  { %v1064_v11 = vadd.f32 %v1063_v8, %v1062_v3  ;;  %v1056_v29 = vrot.slane %v1055_v26, 4  ;;  %v1092_v42 = vmax.f32 %v1090_v37, %v1091_v41  ;;  %v1084_v61 = vrot.slane %v1083_v58, 4  ;;  %781 = vmatpush1.bf16.msra.mxu0 %v2883_v6  ;;  %v2904_v23 = vld [vmem:[%s4248_s2] ss:$8 sps:$4 sm:$0xff]   ;;  %v2932_v41 = vld [vmem:[%s4248_s2 + $0x144] ss:$8 sps:$4 sm:$0xff]  }
   0x7   :  { %v1071_v13 = vadd.f32 %v1070_v10, %v1069_v7  ;;  %v1050_v18 = vadd.f32 %v1049_v14, %v1048_v9  ;;  %v1099_v50 = vmax.f32 %v1097_v44, %v1098_v47  ;;  %v1078_v51 = vmax.f32 %v1076_v45, %v1077_v48  ;;  %v2884_v10 = vld [vmem:[%s4248_s2 + $0x64] ss:$8 sps:$4 sm:$0xff]   ;;  %v2910_v37 = vld [vmem:[%s4248_s2 + $0xe0] ss:$8 sps:$4 sm:$0xff]   ;;  %v2913_v44 = vld [vmem:[%s4248_s2 + $0xd0] ss:$8 sps:$4 sm:$0xff]  }
   0x8   :  { %v1065_v12 = vrot.slane %v1064_v11, 2  ;;  %v1057_v32 = vadd.f32 %v1056_v29, %v1055_v26  ;;  %v1093_v43 = vrot.slane %v1092_v42, 2  ;;  %v1085_v0 = vmax.f32 %v1083_v58, %v1084_v61  ;;  %782 = vmatprep.subr.bf16.mxu0 %v2884_v10  ;;  %v2890_v14 = vld [vmem:[%s4248_s2 + $0x44] ss:$8 sps:$4 sm:$0xff]   ;;  %v2916_v29 = vld [vmem:[%s4248_s2 + $0x170] ss:$8 sps:$4 sm:$0xff]  }
   0x9   :  { %v1072_v17 = vrot.slane %v1071_v13, 2  ;;  %v1051_v21 = vrot.slane %v1050_v18, 2  ;;  %v1100_v53 = vrot.slane %v1099_v50, 2  ;;  %v1079_v54 = vrot.slane %v1078_v51, 2  ;;  %v2949_v45 = vld [vmem:[%s4249_s0 + $0x4] ss:$28 sps:$4 sm:$0xff]  }
   0xa   :  { %v1066_v15 = vadd.f32 %v1065_v12, %v1064_v11  ;;  %v1058_v34 = vrot.slane %v1057_v32, 2  ;;  %v1094_v46 = vmax.f32 %v1092_v42, %v1093_v43  ;;  %v1086_v2 = vrot.slane %v1085_v0, 2  ;;  %v2886_v11 = vld [vmem:[%s4248_s2 + $0x60] ss:$8 sps:$4 sm:$0xff]   ;;  %v2887_v12 = vld [vmem:[%s4248_s2 + $0x54] ss:$8 sps:$4 sm:$0xff]   ;;  %812 = vmatprep.mubr.bf16.mxu0 %v2949_v45 }
   0xb   :  { %v1073_v20 = vadd.f32 %v1072_v17, %v1071_v13  ;;  %v1052_v25 = vadd.f32 %v1051_v21, %v1050_v18  ;;  %v1101_v55 = vmax.f32 %v1099_v50, %v1100_v53  ;;  %v1080_v56 = vmax.f32 %v1078_v51, %v1079_v54  ;;  %783 = vmatpush1.bf16.msra.mxu0 %v2886_v11  ;;  %v2889_v13 = vld [vmem:[%s4248_s2 + $0x50] ss:$8 sps:$4 sm:$0xff]   ;;  %v2896_v18 = vld [vmem:[%s4248_s2 + $0x24] ss:$8 sps:$4 sm:$0xff]   ;;  %v2934_v47 = vld [vmem:[%s4248_s2 + $0x140] ss:$8 sps:$4 sm:$0xff]  }
   0xc   :  { %v1067_v16 = vrot.slane %v1066_v15, 1  ;;  %v1059_v35 = vadd.f32 %v1058_v34, %v1057_v32  ;;  %v1095_v49 = vrot.slane %v1094_v46, 1  ;;  %v1087_v3 = vmax.f32 %v1085_v0, %v1086_v2  ;;  %784 = vmatprep.subr.bf16.mxu0 %v2887_v12  ;;  %v2895_v17 = vld [vmem:[%s4248_s2 + $0x30] ss:$8 sps:$4 sm:$0xff]   ;;  %v2922_v32 = vld [vmem:[%s4248_s2 + $0x160] ss:$8 sps:$4 sm:$0xff]  }
   0xd   :  { %v1074_v24 = vrot.slane %v1073_v20, 1  ;;  %v1053_v28 = vrot.slane %v1052_v25, 1  ;;  %v1102_v57 = vrot.slane %v1101_v55, 1  ;;  %v1081_v59 = vrot.slane %v1080_v56, 1  ;;  %v2901_v21 = vld [vmem:[%s4248_s2 + $0x10] ss:$8 sps:$4 sm:$0xff]  }
   0xe   :  { %v1068_v19 = vadd.f32 %v1067_v16, %v1066_v15  ;;  %v1060_v36 = vrot.slane %v1059_v35, 1  ;;  %v1096_v52 = vmax.f32 %v1094_v46, %v1095_v49  ;;  %v1088_v4 = vrot.slane %v1087_v3, 1  ;;  %v2892_v15 = vld [vmem:[%s4248_s2 + $0x40] ss:$8 sps:$4 sm:$0xff]   ;;  %v2893_v16 = vld [vmem:[%s4248_s2 + $0x34] ss:$8 sps:$4 sm:$0xff]  }
   0xf   :  { %v1075_v27 = vadd.f32 %v1074_v24, %v1073_v20  ;;  %v1054_v31 = vadd.f32 %v1053_v28, %v1052_v25  ;;  %v1103_v60 = vmax.f32 %v1101_v55, %v1102_v57  ;;  %v1082_v62 = vmax.f32 %v1080_v56, %v1081_v59  ;;  %785 = vmatpush1.bf16.msra.mxu0 %v2889_v13  ;;  %v2899_v20 = vld [vmem:[%s4248_s2 + $0x14] ss:$8 sps:$4 sm:$0xff]   ;;  %v2907_v28 = vld [vmem:[%s4248_s2 + $0xf0] ss:$8 sps:$4 sm:$0xff]   ;;  %v2917_v46 = vld [vmem:[%s4248_s2 + $0xc4] ss:$8 sps:$4 sm:$0xff]  }
  0x10   :  { %1116 = vrot.lane.b32.xlu1 %v1068_v19, %s3128_s29  ;;  %1108 = vrot.lane.b32.xlu0 %v1068_v19, %s3129_s30  ;;  %v1164_v30 = vrot.slane %v1068_v19, 7  ;;  %v1061_v38 = vadd.f32 %v1060_v36, %v1059_v35  ;;  %v1390_v63 = vrot.slane %v1096_v52, 7  ;;  %v1089_v7 = vmax.f32 %v1087_v3, %v1088_v4  ;;  %v2905_v24 = vld [vmem:[%s4248_s2 + $0xf4] ss:$8 sps:$4 sm:$0xff]   ;;  %v2919_v51 = vld [vmem:[%s4248_s2 + $0xc0] ss:$8 sps:$4 sm:$0xff]  }
  0x11   :  { %v1181_v39 = vrot.slane %v1075_v27, 7  ;;  %v1406_v8 = vrot.slane %v1103_v60, 7  ;;  %786 = vmatprep.subr.bf16.mxu0 %v2890_v14  ;;  %v2914_v25 = vld [vmem:[%s4248_s2 + $0x174] ss:$8 sps:$4 sm:$0xff]   ;;  %v2940_v53 = vld [vmem:[%s4248_s2 + $0x130] ss:$8 sps:$4 sm:$0xff]  }
  0x12   :  { %v3252_v33 = vsel %vm1165_vm0, %v1164_v30, %v1054_v31  ;;  %v3292_v1 = vsel %vm1165_vm0, %v1390_v63, %v1082_v62  ;;  %v2908_v30 = vld [vmem:[%s4248_s2 + $0xe4] ss:$8 sps:$4 sm:$0xff]   ;;  %833 = vmatprep.subr.bf16.mxu1 %v2914_v25  ;;  %v2926_v34 = vld [vmem:[%s4248_s2 + $0x154] ss:$8 sps:$4 sm:$0xff]   ;;  %v2925_v57 = vld [vmem:[%s4248_s2 + $0xb0] ss:$8 sps:$4 sm:$0xff]  }
  0x13   :  { %v3263_v40 = vsel %vm1165_vm0, %v1181_v39, %v1061_v38  ;;  %v3309_v9 = vsel %vm1165_vm0, %v1406_v8, %v1089_v7  ;;  %787 = vmatpush1.bf16.msra.mxu0 %v2892_v15  ;;  %834 = vmatpush1.bf16.msra.mxu1 %v2916_v29  ;;  %v2928_v39 = vld [vmem:[%s4248_s2 + $0x150] ss:$8 sps:$4 sm:$0xff]   ;;  %v2938_v48 = vld [vmem:[%s4248_s2 + $0x134] ss:$8 sps:$4 sm:$0xff]   ;;  %v2944_v54 = vld [vmem:[%s4248_s2 + $0x124] ss:$8 sps:$4 sm:$0xff]  }
  0x14   :  { %1120 = vrot.lane.b32.xlu1 %v1068_v19, %s3130_s16  ;;  %1112 = vrot.lane.b32.xlu0 %v1068_v19, %s3131_s17  ;;  %v2929_v58 = vld [vmem:[%s4248_s2 + $0xa4] ss:$8 sps:$4 sm:$0xff]   ;;  %v2946_v59 = vld [vmem:[%s4248_s2 + $0x120] ss:$8 sps:$4 sm:$0xff]   ;;  %vm1603_vm6 = vcmask 1041408   ;;  %vm1660_vm7 = vcmask 31744  }
  0x15   :  { %788 = vmatprep.subr.bf16.mxu0 %v2893_v16  ;;  %v2931_v63 = vld [vmem:[%s4248_s2 + $0xa0] ss:$8 sps:$4 sm:$0xff]   ;;  %v2935_v0 = vld [vmem:[%s4248_s2 + $0x94] ss:$8 sps:$4 sm:$0xff]   ;;  %v2955_v2 = vld [vmem:[%s4248_s2 + $0x110] ss:$8 sps:$4 sm:$0xff]  }
  0x16   :  { %v2937_v3 = vld [vmem:[%s4248_s2 + $0x90] ss:$8 sps:$4 sm:$0xff]   ;;  %v2959_v4 = vld [vmem:[%s4248_s2 + $0x104] ss:$8 sps:$4 sm:$0xff]   ;;  %v2961_v8 = vld [vmem:[%s4248_s2 + $0x100] ss:$8 sps:$4 sm:$0xff]  }
  0x17   :  { %789 = vmatpush1.bf16.msra.mxu0 %v2895_v17  ;;  %v2941_v5 = vld [vmem:[%s4248_s2 + $0x84] ss:$8 sps:$4 sm:$0xff]   ;;  %v2965_v10 = vld [vmem:[%s4248_s2 + $0x1f4] ss:$8 sps:$4 sm:$0xff]   ;;  %v2943_v11 = vld [vmem:[%s4248_s2 + $0x80] ss:$8 sps:$4 sm:$0xff]  }
  0x18   :  { %1128 = vrot.lane.b32.xlu1 %v1068_v19, %s3132_s18  ;;  %1124 = vrot.lane.b32.xlu0 %v1068_v19, %s3133_s19  ;;  %v2952_v12 = vld [vmem:[%s4248_s2 + $0x274] ss:$8 sps:$4 sm:$0xff]   ;;  %v2967_v15 = vld [vmem:[%s4248_s2 + $0x1f0] ss:$8 sps:$4 sm:$0xff]   ;;  %vm2096_vm8 = vcmask 1042432   ;;  %vm2117_vm9 = vcmask 1046528  }
  0x19   :  { %790 = vmatprep.subr.bf16.mxu0 %v2896_v18  ;;  %v2947_v16 = vld [vmem:[%s4249_s0] ss:$28 sps:$4 sm:$0xff]   ;;  %v2971_v17 = vld [vmem:[%s4248_s2 + $0x1e4] ss:$8 sps:$4 sm:$0xff]   ;;  %v994_v18 = vlaneseq  ;;  %vm2140_vm10 = vcmask 1045504   ;;  %vm2163_vm11 = vcmask 1044480  }
  0x1a   :  { %vm2186_vm12 = vcmask 1043456   ;;  %vm2245_vm13 = vcmask 261120   ;;  %vm2250_vm14 = vcmask 523264  }
  0x1c   :  { %1138 = vrot.lane.b32.xlu1 %v1075_v27, %s3129_s30  ;;  %1132 = vrot.lane.b32.xlu0 %v1068_v19, %s3134_s20  ;;  %v2898_v19 = vld [vmem:[%s4248_s2 + $0x20] ss:$8 sps:$4 sm:$0xff]  }
  0x1d   :  { %791 = vmatpush1.bf16.msra.mxu0 %v2898_v19  ;;  %v3135_v19 = vmov 1983009808  }
  0x1e   :  { %792 = vmatprep.subr.bf16.mxu0 %v2899_v20  ;;  %v1215_v20 = vunpack.c.l.s4 %v3135_v19 }
  0x20   :  { %1146 = vrot.lane.b32.xlu1 %v1075_v27, %s3128_s29  ;;  %1142 = vrot.lane.b32.xlu0 %v1075_v27, %s3131_s17 }
  0x21   :  { %793 = vmatpush1.bf16.msra.mxu0 %v2901_v21  ;;  %v2950_v21 = vld [vmem:[%s4248_s2 + $0x270] ss:$8 sps:$4 sm:$0xff]  }
  0x22   :  { %794 = vmatprep.subr.bf16.mxu0 %v2902_v22 }
  0x24   :  { %1154 = vrot.lane.b32.xlu1 %v1075_v27, %s3133_s19  ;;  %1150 = vrot.lane.b32.xlu0 %v1075_v27, %s3130_s16 }
  0x25   :  { %795 = vmatpush1.bf16.msra.mxu0 %v2904_v23  ;;  %v2958_v23 = vld [vmem:[%s4248_s2 + $0x264] ss:$8 sps:$4 sm:$0xff]  }
  0x26   :  { %796 = vmatprep.subr.bf16.mxu0 %v2905_v24 }
  0x28   :  { %1162 = vrot.lane.b32.xlu1 %v1075_v27, %s3134_s20  ;;  %1158 = vrot.lane.b32.xlu0 %v1075_v27, %s3132_s18 }
  0x29   :  { %797 = vmatpush2.bf16.msra.mxu0 %v2907_v28  ;;  %v2973_v28 = vld [vmem:[%s4248_s2 + $0x1e0] ss:$8 sps:$4 sm:$0xff]  }
  0x2a   :  { %798 = vmatprep.subr.bf16.mxu0 %v2908_v30 }
  0x2c   :  { %1110 = vrot.lane.b32.xlu1 %v1054_v31, %s3131_s17  ;;  %1106 = vrot.lane.b32.xlu0 %v1054_v31, %s3129_s30 }
  0x2d   :  { %799 = vmatpush2.bf16.msra.mxu0 %v2910_v37  ;;  %v2956_v37 = vld [vmem:[%s4248_s2 + $0x260] ss:$8 sps:$4 sm:$0xff]  }
  0x30   :  { %1118 = vrot.lane.b32.xlu1 %v1054_v31, %s3130_s16  ;;  %1114 = vrot.lane.b32.xlu0 %v1054_v31, %s3128_s29 }
  0x34   :  { %1126 = vrot.lane.b32.xlu1 %v1054_v31, %s3132_s18  ;;  %1122 = vrot.lane.b32.xlu0 %v1054_v31, %s3133_s19 }
  0x38   :  { %1136 = vrot.lane.b32.xlu1 %v1061_v38, %s3129_s30  ;;  %1130 = vrot.lane.b32.xlu0 %v1054_v31, %s3134_s20  ;;  %v2920_v31 = vld [vmem:[%s4248_s2 + $0x164] ss:$8 sps:$4 sm:$0xff]  }
  0x39   :  { %835 = vmatprep.subr.bf16.mxu1 %v2920_v31 }
  0x3a   :  { %836 = vmatpush1.bf16.msra.mxu1 %v2922_v32  ;;  %v3524_v32 = vshrl.u32 %v994_v18, 7 }
  0x3b   :  { %837 = vmatprep.subr.bf16.mxu1 %v2926_v34  ;;  %v1216_v34 = vunpack.c.0.s8 %v1215_v20 }
  0x3c   :  { %1144 = vrot.lane.b32.xlu1 %v1061_v38, %s3128_s29  ;;  %1140 = vrot.lane.b32.xlu0 %v1061_v38, %s3131_s17 }
  0x3e   :  { %838 = vmatpush1.bf16.msra.mxu1 %v2928_v39  ;;  %v3136_v39 = vmov 1934713408  }
  0x3f   :  { %839 = vmatprep.subr.bf16.mxu1 %v2932_v41  ;;  %v1247_v41 = vunpack.c.l.s4 %v3136_v39 }
  0x40   :  { %1152 = vrot.lane.b32.xlu1 %v1061_v38, %s3133_s19  ;;  %1148 = vrot.lane.b32.xlu0 %v1061_v38, %s3130_s16 }
  0x42   :  { %840 = vmatpush1.bf16.msra.mxu1 %v2934_v47 }
  0x43   :  { %841 = vmatprep.subr.bf16.mxu1 %v2938_v48 }
  0x44   :  { %1160 = vrot.lane.b32.xlu1 %v1061_v38, %s3134_s20  ;;  %1156 = vrot.lane.b32.xlu0 %v1061_v38, %s3132_s18  ;;  %v2911_v38 = vld [vmem:[%s4248_s2 + $0xd4] ss:$8 sps:$4 sm:$0xff]  }
  0x45   :  { %800 = vmatprep.subr.bf16.mxu0 %v2911_v38 }
  0x46   :  { %801 = vmatpush2.bf16.msra.mxu0 %v2913_v44  ;;  %842 = vmatpush1.bf16.msra.mxu1 %v2940_v53  ;;  %v2964_v44 = vld [vmem:[%s4248_s2 + $0x254] ss:$8 sps:$4 sm:$0xff]   ;;  %v2979_v53 = vld [vmem:[%s4248_s2 + $0x1d0] ss:$8 sps:$4 sm:$0xff]  }
  0x47   :  { %802 = vmatprep.subr.bf16.mxu0 %v2917_v46  ;;  %843 = vmatprep.subr.bf16.mxu1 %v2944_v54 }
  0x48   :  { %1338 = vrot.lane.b32.xlu1 %v1096_v52, %s3131_s17  ;;  %1334 = vrot.lane.b32.xlu0 %v1096_v52, %s3129_s30 }
  0x4a   :  { %803 = vmatpush2.bf16.msra.mxu0 %v2919_v51  ;;  %844 = vmatpush1.bf16.msra.mxu1 %v2946_v59  ;;  %v3538_v51 = vsub.s32 %v1216_v34, %v3524_v32  ;;  %v2983_v59 = vld [vmem:[%s4248_s2 + $0x1c4] ss:$8 sps:$4 sm:$0xff]   ;;  %v2974_v34 = vld [vmem:[%s4248_s2 + $0x230] ss:$8 sps:$4 sm:$0xff]  }
  0x4c   :  { %1346 = vrot.lane.b32.xlu1 %v1096_v52, %s3130_s16  ;;  %1342 = vrot.lane.b32.xlu0 %v1096_v52, %s3128_s29 }
  0x50   :  { %1354 = vrot.lane.b32.xlu1 %v1096_v52, %s3132_s18  ;;  %1350 = vrot.lane.b32.xlu0 %v1096_v52, %s3133_s19 }
  0x54   :  { %1364 = vrot.lane.b32.xlu1 %v1103_v60, %s3129_s30  ;;  %1358 = vrot.lane.b32.xlu0 %v1096_v52, %s3134_s20  ;;  %v2923_v52 = vld [vmem:[%s4248_s2 + $0xb4] ss:$8 sps:$4 sm:$0xff]  }
  0x55   :  { %804 = vmatprep.subr.bf16.mxu0 %v2923_v52 }
  0x56   :  { %805 = vmatpush2.bf16.msra.mxu0 %v2925_v57 }
  0x57   :  { %806 = vmatprep.subr.bf16.mxu0 %v2929_v58 }
  0x58   :  { %1372 = vrot.lane.b32.xlu1 %v1103_v60, %s3128_s29  ;;  %1368 = vrot.lane.b32.xlu0 %v1103_v60, %s3131_s17 }
  0x5a   :  { %807 = vmatpush2.bf16.msra.mxu0 %v2931_v63 }
  0x5b   :  { %808 = vmatprep.subr.bf16.mxu0 %v2935_v0 }
  0x5c   :  { %1380 = vrot.lane.b32.xlu1 %v1103_v60, %s3133_s19  ;;  %1376 = vrot.lane.b32.xlu0 %v1103_v60, %s3130_s16 }
  0x5e   :  { %809 = vmatpush2.bf16.msra.mxu0 %v2937_v3  ;;  %v2970_v3 = vld [vmem:[%s4248_s2 + $0x244] ss:$8 sps:$4 sm:$0xff]  }
  0x5f   :  { %810 = vmatprep.subr.bf16.mxu0 %v2941_v5 }
  0x60   :  { %1388 = vrot.lane.b32.xlu1 %v1103_v60, %s3134_s20  ;;  %1384 = vrot.lane.b32.xlu0 %v1103_v60, %s3132_s18  ;;  %v2953_v60 = vld [vmem:[%s4248_s2 + $0x114] ss:$8 sps:$4 sm:$0xff]  }
  0x61   :  { %845 = vmatprep.subr.bf16.mxu1 %v2953_v60 }
  0x62   :  { %846 = vmatpush1.bf16.msra.mxu1 %v2955_v2  ;;  %811 = vmatpush2.bf16.msra.mxu0 %v2943_v11 }
  0x63   :  { %847 = vmatprep.subr.bf16.mxu1 %v2959_v4  ;;  %886 = vmatprep.subr.bf16.mxu0 %v2952_v12 }
  0x64   :  { %1336 = vrot.lane.b32.xlu1 %v1082_v62, %s3131_s17  ;;  %1332 = vrot.lane.b32.xlu0 %v1082_v62, %s3129_s30 }
  0x65   :  { %813 = vmatmul.mubr.bf16.vlgmr.msra.gmra.mxu0 %v2947_v16 }
  0x66   :  { %848 = vmatpush1.bf16.msra.mxu1 %v2961_v8  ;;  %887 = vmatpush1.bf16.msra.mxu0 %v2950_v21  ;;  %v2985_v8 = vld [vmem:[%s4248_s2 + $0x1c0] ss:$8 sps:$4 sm:$0xff]  }
  0x67   :  { %849 = vmatprep.subr.bf16.mxu1 %v2965_v10  ;;  %888 = vmatprep.subr.bf16.mxu0 %v2958_v23 }
  0x68   :  { %1344 = vrot.lane.b32.xlu1 %v1082_v62, %s3130_s16  ;;  %1340 = vrot.lane.b32.xlu0 %v1082_v62, %s3128_s29 }
  0x6a   :  { %850 = vmatpush2.bf16.msra.mxu1 %v2967_v15  ;;  %889 = vmatpush1.bf16.msra.mxu0 %v2956_v37  ;;  %v2982_v37 = vld [vmem:[%s4248_s2 + $0x224] ss:$8 sps:$4 sm:$0xff]  }
  0x6b   :  { %851 = vmatprep.subr.bf16.mxu1 %v2971_v17  ;;  %890 = vmatprep.subr.bf16.mxu0 %v2964_v44 }
  0x6c   :  { %1352 = vrot.lane.b32.xlu1 %v1082_v62, %s3132_s18  ;;  %1348 = vrot.lane.b32.xlu0 %v1082_v62, %s3133_s19 }
  0x6e   :  { %852 = vmatpush2.bf16.msra.mxu1 %v2973_v28 }
  0x70   :  { %1362 = vrot.lane.b32.xlu1 %v1089_v7, %s3129_s30  ;;  %1356 = vrot.lane.b32.xlu0 %v1082_v62, %s3134_s20 }
  0x74   :  { %1370 = vrot.lane.b32.xlu1 %v1089_v7, %s3128_s29  ;;  %1366 = vrot.lane.b32.xlu0 %v1089_v7, %s3131_s17 }
  0x78   :  { %1378 = vrot.lane.b32.xlu1 %v1089_v7, %s3133_s19  ;;  %1374 = vrot.lane.b32.xlu0 %v1089_v7, %s3130_s16 }
  0x7c   :  { %1386 = vrot.lane.b32.xlu1 %v1089_v7, %s3134_s20  ;;  %1382 = vrot.lane.b32.xlu0 %v1089_v7, %s3132_s18 }
  0x82   :  { %v3371_v26 = vpop.permute.xlu1 %1116  ;;  %v3373_v27 = vpop.permute.xlu0 %1108 }
  0x83   :  { %v1171_v22 = vrot.slane %v3371_v26, 7  ;;  %v1167_v29 = vrot.slane %v3373_v27, 7  ;;  %v2977_v26 = vld [vmem:[%s4248_s2 + $0x1d4] ss:$8 sps:$4 sm:$0xff]  }
  0x84   :  { %853 = vmatprep.subr.bf16.mxu1 %v2977_v26 }
  0x85   :  { %854 = vmatpush2.bf16.msra.mxu1 %v2979_v53 }
  0x86   :  { %v3393_v35 = vpop.permute.xlu1 %1120  ;;  %v3395_v36 = vpop.permute.xlu0 %1112  ;;  %855 = vmatprep.subr.bf16.mxu1 %v2983_v59 }
  0x87   :  { %v1169_v30 = vrot.slane %v3395_v36, 7  ;;  %v1173_v48 = vrot.slane %v3393_v35, 7  ;;  %v1248_v35 = vunpack.c.0.s8 %v1247_v41 }
  0x89   :  { %v3566_v12 = vsub.s32 %v1248_v35, %v3524_v32  ;;  %856 = vmatpush2.bf16.msra.mxu1 %v2985_v8 }
  0x8a   :  { %v3409_v42 = vpop.permute.xlu1 %1128  ;;  %v3411_v43 = vpop.permute.xlu0 %1124 }
  0x8b   :  { %v1177_v27 = vrot.slane %v3409_v42, 7  ;;  %v1175_v54 = vrot.slane %v3411_v43, 7  ;;  %v2962_v43 = vld [vmem:[%s4248_s2 + $0x250] ss:$8 sps:$4 sm:$0xff]  }
  0x8c   :  { %891 = vmatpush1.bf16.msra.mxu0 %v2962_v43 }
  0x8d   :  { %892 = vmatprep.subr.bf16.mxu0 %v2970_v3 }
  0x8e   :  { %v3428_v49 = vpop.permute.xlu1 %1138  ;;  %v3430_v50 = vpop.permute.xlu0 %1132 }
  0x8f   :  { %v1179_v57 = vrot.slane %v3430_v50, 7 }
  0x92   :  { %v3444_v55 = vpop.permute.xlu1 %1146  ;;  %v3446_v56 = vpop.permute.xlu0 %1142 }
  0x93   :  { %v1187_v10 = vrot.slane %v3444_v55, 7  ;;  %v1185_v11 = vrot.slane %v3446_v56, 7  ;;  %v2968_v55 = vld [vmem:[%s4248_s2 + $0x240] ss:$8 sps:$4 sm:$0xff]  }
  0x94   :  { %893 = vmatpush1.bf16.msra.mxu0 %v2968_v55  ;;  %v3001_v55 = vld [vmem:[%s4248_s2 + $0x194] ss:$8 sps:$4 sm:$0xff]  }
  0x96   :  { %v3460_v61 = vpop.permute.xlu1 %1154  ;;  %v3462_v62 = vpop.permute.xlu0 %1150 }
  0x9a   :  { %v3482_v6 = vpop.permute.xlu1 %1162  ;;  %v3484_v7 = vpop.permute.xlu0 %1158 }
  0x9b   :  { %v1193_v39 = vrot.slane %v3484_v7, 7 }
  0x9e   :  { %v1111_v13 = vpop.permute.xlu1 %1110  ;;  %v1107_v14 = vpop.permute.xlu0 %1106 }
  0x9f   :  { %v1170_v36 = vsel %vm1165_vm0, %v1169_v30, %v1111_v13  ;;  %v1168_v38 = vsel %vm1165_vm0, %v1167_v29, %v1107_v14  ;;  %v2989_v13 = vld [vmem:[%s4248_s2 + $0x1b4] ss:$8 sps:$4 sm:$0xff]   ;;  %v1183_v14 = vrot.slane %v3428_v49, 7 }
  0xa0   :  { %v1213_v52 = vcombine.low %v3252_v33, %v1170_v36  ;;  %v2976_v49 = vld [vmem:[%s4248_s2 + $0x234] ss:$8 sps:$4 sm:$0xff]   ;;  %857 = vmatprep.subr.bf16.mxu1 %v2989_v13  ;;  %v1189_v36 = vrot.slane %v3462_v62, 7 }
  0xa1   :  { %894 = vmatprep.subr.bf16.mxu0 %v2976_v49  ;;  %v3003_v49 = vld [vmem:[%s4248_s2 + $0x190] ss:$8 sps:$4 sm:$0xff]  }
  0xa2   :  { %v1119_v24 = vpop.permute.xlu1 %1118  ;;  %v1115_v25 = vpop.permute.xlu0 %1114  ;;  %v1220_v4 = vrot.slane %v1213_v52, %v3538_v51  ;;  %895 = vmatpush1.bf16.msra.mxu0 %v2974_v34  ;;  %v2988_v52 = vld [vmem:[%s4248_s2 + $0x214] ss:$8 sps:$4 sm:$0xff]  }
  0xa3   :  { %v1172_v31 = vsel %vm1165_vm0, %v1171_v22, %v1115_v25  ;;  %v1174_v58 = vsel %vm1165_vm0, %v1173_v48, %v1119_v24  ;;  %v2991_v24 = vld [vmem:[%s4248_s2 + $0x1b0] ss:$8 sps:$4 sm:$0xff]   ;;  %896 = vmatprep.subr.bf16.mxu0 %v2982_v37  ;;  %v3018_v34 = vld [vmem:[%s4248_s2 + $0x354] ss:$8 sps:$4 sm:$0xff]  }
  0xa4   :  { %v1221_v45 = vcombine.low %v1168_v38, %v1172_v31  ;;  %858 = vmatpush2.bf16.msra.mxu1 %v2991_v24  ;;  %v1195_v38 = vrot.slane %v3482_v6, 7  ;;  %v3007_v24 = vld [vmem:[%s4248_s2 + $0x184] ss:$8 sps:$4 sm:$0xff]  }
  0xa6   :  { %v1127_v46 = vpop.permute.xlu1 %1126  ;;  %v1123_v47 = vpop.permute.xlu0 %1122  ;;  %v1228_v60 = vrot.slane %v1221_v45, %v3538_v51 }
  0xa7   :  { %v1178_v42 = vsel %vm1165_vm0, %v1177_v27, %v1127_v46  ;;  %v1176_v50 = vsel %vm1165_vm0, %v1175_v54, %v1123_v47  ;;  %v1191_v27 = vrot.slane %v3460_v61, 7  ;;  %v2980_v61 = vld [vmem:[%s4248_s2 + $0x220] ss:$8 sps:$4 sm:$0xff]  }
  0xa8   :  { %v1229_v33 = vcombine.low %v1174_v58, %v1178_v42  ;;  %v1245_v20 = vcombine.low %v1220_v4, %v1228_v60  ;;  %897 = vmatpush1.bf16.msra.mxu0 %v2980_v61  ;;  %v2994_v4 = vld [vmem:[%s4248_s2 + $0x204] ss:$8 sps:$4 sm:$0xff]  }
  0xa9   :  { %898 = vmatprep.subr.bf16.mxu0 %v2988_v52  ;;  %v3033_v61 = vld [vmem:[%s4248_s2 + $0x2a4] ss:$8 sps:$4 sm:$0xff]  }
  0xaa   :  { %v1137_v63 = vpop.permute.xlu1 %1136  ;;  %v1131_v0 = vpop.permute.xlu0 %1130  ;;  %v1236_v15 = vrot.slane %v1229_v33, %v3538_v51  ;;  %v1252_v31 = vrot.slane %v1245_v20, %v3566_v12  ;;  %v2998_v20 = vld [vmem:[%s4248_s2 + $0x2f0] ss:$8 sps:$4 sm:$0xff]  }
  0xab   :  { %v1180_v2 = vsel %vm1165_vm0, %v1179_v57, %v1131_v0  ;;  %v1184_v22 = vsel %vm1165_vm0, %v1183_v14, %v1137_v63  ;;  %v2986_v63 = vld [vmem:[%s4248_s2 + $0x210] ss:$8 sps:$4 sm:$0xff]  }
  0xac   :  { %v1237_v5 = vcombine.low %v1176_v50, %v1180_v2  ;;  %899 = vmatpush1.bf16.msra.mxu0 %v2986_v63 }
  0xad   :  { %900 = vmatprep.subr.bf16.mxu0 %v2994_v4 }
  0xae   :  { %v1244_v16 = vrot.slane %v1237_v5, %v3538_v51  ;;  %v1145_v17 = vpop.permute.xlu1 %1144  ;;  %v1141_v19 = vpop.permute.xlu0 %1140 }
  0xaf   :  { %v1188_v56 = vsel %vm1165_vm0, %v1187_v10, %v1145_v17  ;;  %v1186_v21 = vsel %vm1165_vm0, %v1185_v11, %v1141_v19  ;;  %v2992_v10 = vld [vmem:[%s4248_s2 + $0x200] ss:$8 sps:$4 sm:$0xff]   ;;  %v2995_v11 = vld [vmem:[%s4248_s2 + $0x1a4] ss:$8 sps:$4 sm:$0xff]   ;;  %v3000_v19 = vld [vmem:[%s4248_s2 + $0x2f4] ss:$8 sps:$4 sm:$0xff]  }
  0xb0   :  { %v1253_v23 = vcombine.low %v1236_v15, %v1244_v16  ;;  %v1271_v25 = vcombine.low %v1184_v22, %v1188_v56  ;;  %v1263_v28 = vcombine.low %v3263_v40, %v1186_v21  ;;  %901 = vmatpush1.bf16.msra.mxu0 %v2992_v10  ;;  %v2997_v17 = vld [vmem:[%s4248_s2 + $0x1a0] ss:$8 sps:$4 sm:$0xff]   ;;  %859 = vmatprep.subr.bf16.mxu1 %v2995_v11 }
  0xb1   :  { %860 = vmatpush2.bf16.msra.mxu1 %v2997_v17  ;;  %902 = vmatprep.subr.bf16.mxu0 %v3000_v19  ;;  %v3004_v22 = vld [vmem:[%s4248_s2 + $0x2e0] ss:$8 sps:$4 sm:$0xff]  }
  0xb2   :  { %v1153_v29 = vpop.permute.xlu1 %1152  ;;  %v1149_v30 = vpop.permute.xlu0 %1148  ;;  %v1260_v26 = vrot.slane %v1253_v23, %v3566_v12  ;;  %v1278_v41 = vrot.slane %v1271_v25, %v3538_v51  ;;  %v1270_v44 = vrot.slane %v1263_v28, %v3538_v51  ;;  %861 = vmatprep.subr.bf16.mxu1 %v3001_v55  ;;  %v3006_v23 = vld [vmem:[%s4248_s2 + $0x2e4] ss:$8 sps:$4 sm:$0xff]   ;;  %v3009_v25 = vld [vmem:[%s4248_s2 + $0x180] ss:$8 sps:$4 sm:$0xff]  }
  0xb3   :  { %v1192_v45 = vsel %vm1165_vm0, %v1191_v27, %v1153_v29  ;;  %v1190_v62 = vsel %vm1165_vm0, %v1189_v36, %v1149_v30  ;;  %v3012_v30 = vld [vmem:[%s4248_s2 + $0x2d4] ss:$8 sps:$4 sm:$0xff]   ;;  %v3016_v36 = vld [vmem:[%s4248_s2 + $0x350] ss:$8 sps:$4 sm:$0xff]  }
  0xb4   :  { %v1261_v40 = vcombine.low %v1252_v31, %v1260_v26  ;;  %v1262_v42 = vcombine.high %v1252_v31, %v1260_v26  ;;  %v1295_v33 = vcombine.low %v1270_v44, %v1278_v41  ;;  %903 = vmatpush2.bf16.msra.mxu0 %v2998_v20  ;;  %v3010_v31 = vld [vmem:[%s4248_s2 + $0x2d0] ss:$8 sps:$4 sm:$0xff]   ;;  %v3015_v26 = vld [vmem:[%s4249_s0 + $0xc] ss:$28 sps:$4 sm:$0xff]  }
  0xb5   :  { %862 = vmatpush2.bf16.msra.mxu1 %v3003_v49  ;;  %904 = vmatprep.subr.bf16.mxu0 %v3006_v23  ;;  %v3024_v41 = vld [vmem:[%s4248_s2 + $0x344] ss:$8 sps:$4 sm:$0xff]  }
  0xb6   :  { %v1161_v46 = vpop.permute.xlu1 %1160  ;;  %v1157_v47 = vpop.permute.xlu0 %1156  ;;  %v1314_v48 = vsel %vm1313_vm1, %v1261_v40, 0.0  ;;  %v1320_v60 = vsel %vm1313_vm1, %v1262_v42, 0.0  ;;  %v1302_v2 = vrot.slane %v1295_v33, %v3566_v12  ;;  %863 = vmatprep.subr.bf16.mxu1 %v3007_v24  ;;  %v3013_v40 = vld [vmem:[%s4249_s0 + $0x8] ss:$28 sps:$4 sm:$0xff]   ;;  %865 = vmatprep.mubr.bf16.mxu1 %v3015_v26  ;;  %v3030_v42 = vld [vmem:[%s4248_s2 + $0x334] ss:$8 sps:$4 sm:$0xff]  }
  0xb7   :  { %v1196_v6 = vsel %vm1165_vm0, %v1195_v38, %v1161_v46  ;;  %v1194_v7 = vsel %vm1165_vm0, %v1193_v39, %v1157_v47  ;;  %1315 = vadd.xlane.f32.xlu0 %v1314_v48  ;;  %v3021_v38 = vld [vmem:[%s4248_s2 + $0x2c4] ss:$8 sps:$4 sm:$0xff]   ;;  %v3019_v39 = vld [vmem:[%s4248_s2 + $0x2c0] ss:$8 sps:$4 sm:$0xff]   ;;  %v3025_v47 = vld [vmem:[%s4248_s2 + $0x2b0] ss:$8 sps:$4 sm:$0xff]  }
  0xb8   :  { %v1287_v53 = vcombine.low %v1192_v45, %v1196_v6  ;;  %v1279_v54 = vcombine.low %v1190_v62, %v1194_v7  ;;  %905 = vmatpush2.bf16.msra.mxu0 %v3004_v22  ;;  %v3022_v46 = vld [vmem:[%s4248_s2 + $0x340] ss:$8 sps:$4 sm:$0xff]   ;;  %v3027_v48 = vld [vmem:[%s4248_s2 + $0x2b4] ss:$8 sps:$4 sm:$0xff]   ;;  %v3028_v62 = vld [vmem:[%s4248_s2 + $0x330] ss:$8 sps:$4 sm:$0xff]  }
  0xb9   :  { %864 = vmatpush2.bf16.msra.mxu1 %v3009_v25  ;;  %906 = vmatprep.subr.bf16.mxu0 %v3012_v30  ;;  %v3037_v6 = vld [vmem:[%s4249_s0 + $0x3c] ss:$28 sps:$4 sm:$0xff]   ;;  %v3049_v22 = vld [vmem:[%s4248_s2 + $0x280] ss:$8 sps:$4 sm:$0xff]  }
  0xba   :  { %v1294_v57 = vrot.slane %v1287_v53, %v3538_v51  ;;  %v1286_v58 = vrot.slane %v1279_v54, %v3538_v51  ;;  %v3614_v35 = vpop.permute.xlu1 %1338  ;;  %v3616_v59 = vpop.permute.xlu0 %1334  ;;  %943 = vmatprep.subr.bf16.mxu1 %v3018_v34  ;;  %v3039_v7 = vld [vmem:[%s4249_s0 + $0x38] ss:$28 sps:$4 sm:$0xff]   ;;  %v3031_v54 = vld [vmem:[%s4248_s2 + $0x2a0] ss:$8 sps:$4 sm:$0xff]   ;;  %822 = vmatprep.mubr.bf16.mxu0 %v3037_v6 }
  0xbb   :  { %1321 = vadd.xlane.f32.xlu0 %v1320_v60  ;;  %v3042_v60 = vld [vmem:[%s4248_s2 + $0x294] ss:$8 sps:$4 sm:$0xff]   ;;  %823 = vmatmul.mubr.bf16.gmra.mxu0 %v3039_v7  ;;  %v1392_v10 = vrot.slane %v3616_v59, 7  ;;  %v3046_v59 = vld [vmem:[%s4248_s2 + $0x310] ss:$8 sps:$4 sm:$0xff]  }
  0xbc   :  { %v1303_v0 = vcombine.low %v1286_v58, %v1294_v57  ;;  %907 = vmatpush2.bf16.msra.mxu0 %v3010_v31  ;;  %866 = vmatmul.mubr.bf16.vlgmr.msra.gmra.mxu1 %v3013_v40  ;;  %v3036_v57 = vld [vmem:[%s4248_s2 + $0x324] ss:$8 sps:$4 sm:$0xff]   ;;  %v3045_v33 = vld [vmem:[%s4249_s0 + $0x40] ss:$28 sps:$4 sm:$0xff]  }
  0xbd   :  { %944 = vmatpush1.bf16.msra.mxu1 %v3016_v36  ;;  %908 = vmatprep.subr.bf16.mxu0 %v3021_v38  ;;  %v3043_v58 = vld [vmem:[%s4249_s0 + $0x44] ss:$28 sps:$4 sm:$0xff]  }
  0xbe   :  { %v3622_v43 = vpop.permute.xlu1 %1346  ;;  %v3624_v50 = vpop.permute.xlu0 %1342  ;;  %v1310_v3 = vrot.slane %v1303_v0, %v3566_v12  ;;  %945 = vmatprep.subr.bf16.mxu1 %v3024_v41  ;;  %875 = vmatprep.mubr.bf16.mxu1 %v3043_v58  ;;  %v3034_v0 = vld [vmem:[%s4248_s2 + $0x320] ss:$8 sps:$4 sm:$0xff]  }
  0xbf   :  { %v1396_v63 = vrot.slane %v3624_v50, 7  ;;  %v3048_v50 = vld [vmem:[%s4248_s2 + $0x314] ss:$8 sps:$4 sm:$0xff]   ;;  %v1398_v23 = vrot.slane %v3622_v43, 7  ;;  %v3052_v34 = vld [vmem:[%s4248_s2 + $0x300] ss:$8 sps:$4 sm:$0xff]  }
  0xc0   :  { %v1311_v5 = vcombine.low %v1302_v2, %v1310_v3  ;;  %v1312_v8 = vcombine.high %v1302_v2, %v1310_v3  ;;  %909 = vmatpush2.bf16.msra.mxu0 %v3019_v39  ;;  %v3057_v2 = vld [vmem:[%s4249_s0 + $0x14] ss:$28 sps:$4 sm:$0xff]   ;;  %v3061_v58 = vld [vmem:[%s4249_s0 + $0x48] ss:$28 sps:$4 sm:$0xff]  }
  0xc1   :  { %910 = vmatprep.subr.bf16.mxu0 %v3027_v48  ;;  %946 = vmatpush1.bf16.msra.mxu1 %v3022_v46  ;;  %v3055_v43 = vld [vmem:[%s4249_s0 + $0x10] ss:$28 sps:$4 sm:$0xff]  }
  0xc2   :  { %v3637_v13 = vpop.permute.xlu1 %1354  ;;  %v3639_v14 = vpop.permute.xlu0 %1350  ;;  %v1317_v15 = vsel %vm1313_vm1, %v1311_v5, 0.0  ;;  %v1323_v16 = vsel %vm1313_vm1, %v1312_v8, 0.0  ;;  %947 = vmatprep.subr.bf16.mxu1 %v3030_v42  ;;  %v3040_v5 = vld [vmem:[%s4248_s2 + $0x290] ss:$8 sps:$4 sm:$0xff]   ;;  %v1394_v8 = vrot.slane %v3614_v35, 7  ;;  %918 = vmatprep.mubr.bf16.mxu0 %v3057_v2 }
  0xc3   :  { %1318 = vadd.xlane.f32.xlu1 %v1317_v15  ;;  %1324 = vadd.xlane.f32.xlu0 %v1323_v16  ;;  %v3051_v15 = vld [vmem:[%s4248_s2 + $0x284] ss:$8 sps:$4 sm:$0xff]   ;;  %v3137_v16 = vmov 0   ;;  %v1402_v17 = vrot.slane %v3637_v13, 7  ;;  %v1400_v30 = vrot.slane %v3639_v14, 7 }
  0xc4   :  { %911 = vmatpush2.bf16.msra.mxu0 %v3025_v47  ;;  %876 = vmatmul.mubr.bf16.gmra.mxu1 %v3045_v33  ;;  %v3054_v13 = vld [vmem:[%s4248_s2 + $0x304] ss:$8 sps:$4 sm:$0xff]   ;;  %v3058_v47 = vld [vmem:[%s4249_s0 + $0x18] ss:$28 sps:$4 sm:$0xff]  }
  0xc5   :  { %912 = vmatprep.subr.bf16.mxu0 %v3033_v61  ;;  %948 = vmatpush1.bf16.msra.mxu1 %v3028_v62  ;;  %v3059_v14 = vld [vmem:[%s4249_s0 + $0x4c] ss:$28 sps:$4 sm:$0xff]  }
  0xc6   :  { %v3655_v56 = vpop.permute.xlu1 %1364  ;;  %v3657_v21 = vpop.permute.xlu0 %1358  ;;  %949 = vmatprep.subr.bf16.mxu1 %v3036_v57  ;;  %971 = vmatprep.mubr.bf16.mxu1 %v3137_v16 }
  0xc7   :  { %v1404_v31 = vrot.slane %v3657_v21, 7 }
  0xc8   :  { %913 = vmatpush2.bf16.msra.mxu0 %v3031_v54 }
  0xc9   :  { %914 = vmatprep.subr.bf16.mxu0 %v3042_v60  ;;  %950 = vmatpush1.bf16.msra.mxu1 %v3034_v0 }
  0xca   :  { %v3674_v28 = vpop.permute.xlu1 %1372  ;;  %v3676_v29 = vpop.permute.xlu0 %1368  ;;  %951 = vmatprep.subr.bf16.mxu1 %v3048_v50 }
  0xcb   :  { %v1412_v48 = vrot.slane %v3674_v28, 7  ;;  %v1410_v42 = vrot.slane %v3676_v29, 7 }
  0xcc   :  { %915 = vmatpush2.bf16.msra.mxu0 %v3040_v5 }
  0xcd   :  { %916 = vmatprep.subr.bf16.mxu0 %v3051_v15  ;;  %952 = vmatpush1.bf16.msra.mxu1 %v3046_v59 }
  0xce   :  { %v3690_v37 = vpop.permute.xlu1 %1380  ;;  %v3692_v27 = vpop.permute.xlu0 %1376  ;;  %953 = vmatprep.subr.bf16.mxu1 %v3054_v13 }
  0xcf   :  { %v1416_v5 = vrot.slane %v3690_v37, 7  ;;  %v1414_v50 = vrot.slane %v3692_v27, 7 }
  0xd0   :  { %917 = vmatpush2.bf16.msra.mxu0 %v3049_v22 }
  0xd1   :  { %2389 = vmatprep.subr.bf16.mxu0 %v3137_v16  ;;  %954 = vmatpush1.bf16.msra.mxu1 %v3052_v34 }
  0xd2   :  { %v3709_v44 = vpop.permute.xlu1 %1388  ;;  %v3711_v45 = vpop.permute.xlu0 %1384 }
  0xd3   :  { %919 = vmatmul.mubr.bf16.vlgmr.msra.gmra.mxu0 %v3055_v43  ;;  %v3138_v43 = vmov 0.0  }
  0xd4   :  { %928 = vmatprep.mubr.bf16.mxu0 %v3059_v14  ;;  %2685 = vmatmul.mubr.msk.bf16.vlgmr.msra.gmra.mxu1 %vm773_vm2, %v3058_v47 }
  0xd5   :  { %981 = vmatprep.mubr.bf16.mxu1 %v3137_v16  ;;  %2766 = vmatprep.subr.bf16.mxu1 %v3138_v43 }
  0xd6   :  { %v1337_v52 = vpop.permute.xlu1 %1336  ;;  %v1333_v53 = vpop.permute.xlu0 %1332 }
  0xd7   :  { %v1395_v19 = vsel %vm1165_vm0, %v1394_v8, %v1337_v52  ;;  %v1393_v35 = vsel %vm1165_vm0, %v1392_v10, %v1333_v53  ;;  %v1408_v53 = vrot.slane %v3655_v56, 7  ;;  %v1420_v8 = vrot.slane %v3709_v44, 7 }
  0xd8   :  { %v1438_v25 = vcombine.low %v3292_v1, %v1395_v19  ;;  %v1418_v10 = vrot.slane %v3711_v45, 7 }
  0xda   :  { %v1345_v3 = vpop.permute.xlu1 %1344  ;;  %v1341_v4 = vpop.permute.xlu0 %1340  ;;  %v1445_v41 = vrot.slane %v1438_v25, %v3538_v51 }
  0xdb   :  { %v1397_v11 = vsel %vm1165_vm0, %v1396_v63, %v1341_v4  ;;  %v1399_v26 = vsel %vm1165_vm0, %v1398_v23, %v1345_v3  ;;  %v3062_v4 = vld [vmem:[%s4249_s0 + $0x50] ss:$28 sps:$4 sm:$0xff]   ;;  %929 = vmatmul.mubr.bf16.gmra.mxu0 %v3061_v58 }
  0xdc   :  { %v1446_v20 = vcombine.low %v1393_v35, %v1397_v11  ;;  %2686 = vmatmul.mubr.msk.bf16.gmra.mxu1 %vm773_vm2, %v3062_v4 }
  0xdd   :  { %2768 = vmatprep.mubr.msk.bf16.mxu1 %vm3139_vm3, %v3138_v43 }
  0xde   :  { %v1353_v55 = vpop.permute.xlu1 %1352  ;;  %v1349_v49 = vpop.permute.xlu0 %1348  ;;  %v1453_v40 = vrot.slane %v1446_v20, %v3538_v51 }
  0xdf   :  { %v1403_v24 = vsel %vm1165_vm0, %v1402_v17, %v1353_v55  ;;  %v1401_v21 = vsel %vm1165_vm0, %v1400_v30, %v1349_v49 }
  0xe0   :  { %v1454_v36 = vcombine.low %v1399_v26, %v1403_v24  ;;  %v1470_v52 = vcombine.low %v1445_v41, %v1453_v40  ;;  %v1555_v40 = vand.u32 127, %v994_v18 }
  0xe2   :  { %v1363_v38 = vpop.permute.xlu1 %1362  ;;  %v1357_v1 = vpop.permute.xlu0 %1356  ;;  %v1461_v61 = vrot.slane %v1454_v36, %v3538_v51  ;;  %v1477_v0 = vrot.slane %v1470_v52, %v3566_v12  ;;  %v1558_v47 = vsub.s32 %v1555_v40, %v3524_v32 }
  0xe3   :  { %v1405_v39 = vsel %vm1165_vm0, %v1404_v31, %v1357_v1  ;;  %v1409_v29 = vsel %vm1165_vm0, %v1408_v53, %v1363_v38  ;;  %v1560_v38 = vadd.s32 4294967288, %v1555_v40 }
  0xe4   :  { %v1462_v46 = vcombine.low %v1401_v21, %v1405_v39 }
  0xe5   :  { %v1563_v21 = vsub.s32 %v1560_v38, %v3524_v32 }
  0xe6   :  { %v1469_v62 = vrot.slane %v1462_v46, %v3538_v51  ;;  %v1371_v6 = vpop.permute.xlu1 %1370  ;;  %v1367_v7 = vpop.permute.xlu0 %1366 }
  0xe7   :  { %v1413_v54 = vsel %vm1165_vm0, %v1412_v48, %v1371_v6  ;;  %v1411_v57 = vsel %vm1165_vm0, %v1410_v42, %v1367_v7 }
  0xe8   :  { %v1478_v28 = vcombine.low %v1461_v61, %v1469_v62  ;;  %v1496_v60 = vcombine.low %v1409_v29, %v1413_v54  ;;  %v1488_v33 = vcombine.low %v3309_v9, %v1411_v57 }
  0xea   :  { %v1379_v63 = vpop.permute.xlu1 %1378  ;;  %v1375_v56 = vpop.permute.xlu0 %1374  ;;  %v1485_v2 = vrot.slane %v1478_v28, %v3566_v12  ;;  %v1503_v9 = vrot.slane %v1496_v60, %v3538_v51  ;;  %v1495_v11 = vrot.slane %v1488_v33, %v3538_v51 }
  0xeb   :  { %v1417_v59 = vsel %vm1165_vm0, %v1416_v5, %v1379_v63  ;;  %v1415_v37 = vsel %vm1165_vm0, %v1414_v50, %v1375_v56 }
  0xec   :  { %v1486_v3 = vcombine.low %v1477_v0, %v1485_v2  ;;  %v1487_v35 = vcombine.high %v1477_v0, %v1485_v2  ;;  %v1520_v13 = vcombine.low %v1495_v11, %v1503_v9  ;;  %v1659_v0 = vld [vmem:[%s4251_s5] sm:$0x3] }
  0xee   :  { %v1387_v15 = vpop.permute.xlu1 %1386  ;;  %v1383_v17 = vpop.permute.xlu0 %1382  ;;  %v1538_v19 = vsel %vm1313_vm1, %v1486_v3, -inf  ;;  %v1544_v22 = vsel %vm1313_vm1, %v1487_v35, -inf  ;;  %v1527_v24 = vrot.slane %v1520_v13, %v3566_v12 }
  0xef   :  { %v1421_v27 = vsel %vm1165_vm0, %v1420_v8, %v1387_v15  ;;  %v1419_v44 = vsel %vm1165_vm0, %v1418_v10, %v1383_v17  ;;  %1539 = vmax.xlane.f32.xlu1 %v1538_v19  ;;  %v1665_v8 = vsel %vm1603_vm6, %v1659_v0, 0 }
  0xf0   :  { %v1512_v45 = vcombine.low %v1417_v59, %v1421_v27  ;;  %v1504_v20 = vcombine.low %v1415_v37, %v1419_v44 }
  0xf2   :  { %v1519_v55 = vrot.slane %v1512_v45, %v3538_v51  ;;  %v1511_v49 = vrot.slane %v1504_v20, %v3538_v51  ;;  %v3063_v51 = vld [vmem:[%s4250_s4] sm:$0xff]  }
  0xf3   :  { %1545 = vmax.xlane.f32.xlu1 %v1544_v22  ;;  %2767 = vmatpush3.bf16.msra.mxu1 %v3063_v51 }
  0xf4   :  { %v1528_v23 = vcombine.low %v1511_v49, %v1519_v55  ;;  %2772 = vmatprep.subr.bf16.mxu1 %v3138_v43 }
  0xf6   :  { %v1535_v25 = vrot.slane %v1528_v23, %v3566_v12 }
  0xf8   :  { %v1536_v30 = vcombine.low %v1527_v24, %v1535_v25  ;;  %v1537_v26 = vcombine.high %v1527_v24, %v1535_v25 }
  0xfa   :  { %v1541_v31 = vsel %vm1313_vm1, %v1536_v30, -inf  ;;  %v1547_v34 = vsel %vm1313_vm1, %v1537_v26, -inf }
  0xfb   :  { %1542 = vmax.xlane.f32.xlu0 %v1541_v31 }
  0xff   :  { %1548 = vmax.xlane.f32.xlu0 %v1547_v34 }
 0x125   :  { %v814_v28 = vpop.f32.mrf.mxu0 }
 0x127   :  { %v816_v4 = vpop.f32.mrf.mxu0 }
 0x129   :  { %v818_v9 = vpop.f32.mrf.mxu0 }
 0x12b   :  { %v820_v19 = vpop.f32.mrf.mxu0 }
 0x140   :  { %v1316_v12 = vpop.xlane.xlu0 %1315 }
 0x141   :  { %v1326_v48 = vmul.f32 0.00390625, %v1316_v12 }
 0x143   :  { %v1559_v7 = vrot.slane %v1326_v48, %v1558_v47 }
 0x144   :  { %v1322_v36 = vpop.xlane.xlu0 %1321 }
 0x145   :  { %v1328_v42 = vmul.f32 0.00390625, %v1322_v36 }
 0x147   :  { %v1570_v18 = vrot.slane %v1328_v42, %v1558_v47 }
 0x14c   :  { %v1319_v1 = vpop.xlane.xlu1 %1318  ;;  %v1325_v14 = vpop.xlane.xlu0 %1324 }
 0x14d   :  { %v1327_v39 = vmul.f32 0.00390625, %v1319_v1  ;;  %v1329_v46 = vmul.f32 0.00390625, %v1325_v14 }
 0x14f   :  { %v1564_v61 = vrot.slane %v1327_v39, %v1563_v21  ;;  %v1574_v6 = vrot.slane %v1329_v46, %v1563_v21 }
 0x151   :  { %v1566_v54 = vsel %vm1565_vm4, %v1564_v61, %v1559_v7  ;;  %v1575_v29 = vsel %vm1565_vm4, %v1574_v6, %v1570_v18 }
 0x152   :  { %v1576_v2 = vsel %vm1165_vm0, %v1575_v29, %v1566_v54 }
 0x178   :  { %v1540_v41 = vpop.xlane.xlu1 %1539 }
 0x179   :  { %v1585_v58 = vrot.slane %v1540_v41, %v1558_v47 }
 0x17b   :  { %v824_v44 = vpop.f32.mrf.mxu0 }
 0x17c   :  { %v1546_v52 = vpop.xlane.xlu1 %1545  ;;  %v867_v10 = vpop.f32.mrf.mxu1 }
 0x17d   :  { %v1594_v60 = vrot.slane %v1546_v52, %v1558_v47  ;;  %v868_v11 = vadd.f32 %v867_v10, %v814_v28  ;;  %v826_v45 = vpop.f32.mrf.mxu0 }
 0x17e   :  { %v869_v15 = vpop.f32.mrf.mxu1 }
 0x17f   :  { %v870_v17 = vadd.f32 %v869_v15, %v816_v4  ;;  %v828_v49 = vpop.f32.mrf.mxu0  ;;  %v3064_v4 = vld [vmem:[%s4252_s6] ss:$8 sps:$4 sm:$0xff]  }
 0x180   :  { %v871_v35 = vpop.f32.mrf.mxu1 }
 0x181   :  { %v872_v59 = vadd.f32 %v871_v35, %v818_v9  ;;  %v830_v25 = vpop.f32.mrf.mxu0 }
 0x182   :  { %v873_v37 = vpop.f32.mrf.mxu1 }
 0x183   :  { %v874_v27 = vadd.f32 %v873_v37, %v820_v19  ;;  %v3068_v37 = vld [vmem:[%s4253_s8 + $0x38] sm:$0xff]  }
 0x184   :  { %v1543_v62 = vpop.xlane.xlu0 %1542  ;;  %v877_v20 = vpop.f32.mrf.mxu1 }
 0x185   :  { %v1589_v53 = vrot.slane %v1543_v62, %v1563_v21  ;;  %v878_v55 = vadd.f32 %v877_v20, %v824_v44  ;;  %v3069_v44 = vld [vmem:[%s4253_s8 + $0x70] sm:$0xff]   ;;  %v3071_v20 = vld [vmem:[%s4253_s8 + $0x68] sm:$0xff]  }
 0x186   :  { %v879_v22 = vpop.f32.mrf.mxu1 }
 0x187   :  { %v1590_v63 = vsel %vm1565_vm4, %v1589_v53, %v1585_v58  ;;  %v880_v13 = vadd.f32 %v879_v22, %v826_v45  ;;  %v3070_v45 = vld [vmem:[%s4253_s8 + $0x30] sm:$0xff]   ;;  %v3074_v22 = vld [vmem:[%s4253_s8 + $0x20] sm:$0xff]  }
 0x188   :  { %v1549_v57 = vpop.xlane.xlu0 %1548  ;;  %v881_v23 = vpop.f32.mrf.mxu1 }
 0x189   :  { %v1598_v33 = vrot.slane %v1549_v57, %v1563_v21  ;;  %v882_v24 = vadd.f32 %v881_v23, %v828_v49  ;;  %v3073_v49 = vld [vmem:[%s4253_s8 + $0x60] sm:$0xff]   ;;  %v3076_v23 = vld [vmem:[%s4253_s8 + $0x18] sm:$0xff]  }
 0x18a   :  { %v883_v30 = vpop.f32.mrf.mxu1 }
 0x18b   :  { %v1599_v56 = vsel %vm1565_vm4, %v1598_v33, %v1594_v60  ;;  %v3864_v31 = vadd.f32 %v883_v30, %v830_v25  ;;  %v3078_v25 = vld [vmem:[%s4253_s8 + $0x10] sm:$0xff]   ;;  %v3079_v30 = vld [vmem:[%s4253_s8 + $0x48] sm:$0xff]  }
 0x18c   :  { %v1601_v3 = vsel %vm1600_vm5, %v1599_v56, %v1590_v63 }
 0x18d   :  { %v1604_v5 = vsel %vm1603_vm6, %v1576_v2, %v1601_v3  ;;  %v3066_v3 = vld [vmem:[%s4252_s6 + $0x4] ss:$8 sps:$4 sm:$0xff]  }
 0x18e   :  { %v1605_v50 = vpack.c.bf16 %v1604_v5, %v1604_v5  ;;  %v3067_v5 = vld [vmem:[%s4253_s8 + $0x78] sm:$0xff]  }
 0x190   :  { %2769 = vmatmul.mubr.msk.bf16.vlgmr.msra.gmra.mxu1 %vm1313_vm1, %v1605_v50 }
 0x191   :  { %2773 = vmatpush3.bf16.msra.mxu1 %v1665_v8  ;;  %2774 = vmatprep.mubr.msk.bf16.mxu1 %vm3139_vm3, %v3138_v43 }
 0x192   :  { %1747 = vmatprep.subr.bf16.mxu1 %v3066_v3  ;;  %v3123_v3 = vld [vmem:[%s4247_s1 + $0x18] sm:$0xff] }
 0x193   :  { %v920_v26 = vpop.f32.mrf.mxu0 }
 0x194   :  { %v921_v34 = vadd.f32 %v920_v26, %v868_v11  ;;  %v973_v12 = vpop.f32.mrf.mxu1  ;;  %v3080_v26 = vld [vmem:[%s4253_s8 + $0x8] sm:$0xff]  }
 0x195   :  { %v922_v43 = vpop.f32.mrf.mxu0 }
 0x196   :  { %v923_v51 = vadd.f32 %v922_v43, %v870_v17  ;;  %v3866_v40 = vadd.f32 %v973_v12, %v921_v34  ;;  %v975_v1 = vpop.f32.mrf.mxu1  ;;  %v3081_v34 = vld [vmem:[%s4253_s8 + $0x40] sm:$0xff]  }
 0x197   :  { %v924_v36 = vpop.f32.mrf.mxu0  ;;  %v3082_v43 = vld [vmem:[%s4253_s8] sm:$0xff]  }
 0x198   :  { %v925_v38 = vadd.f32 %v924_v36, %v872_v59  ;;  %v3868_v14 = vadd.f32 %v975_v1, %v923_v51  ;;  %v977_v41 = vpop.f32.mrf.mxu1  ;;  %v3140_v51 = vmov 1966171168  }
 0x199   :  { %v926_v21 = vpop.f32.mrf.mxu0  ;;  %v1778_v12 = vunpack.c.l.s4 %v3140_v51 }
 0x19a   :  { %v927_v39 = vadd.f32 %v926_v21, %v874_v27  ;;  %v3870_v46 = vadd.f32 %v977_v41, %v925_v38  ;;  %v979_v48 = vpop.f32.mrf.mxu1 }
 0x19b   :  { %v930_v47 = vpop.f32.mrf.mxu0  ;;  %v1779_v36 = vunpack.c.0.s8 %v1778_v12 }
 0x19c   :  { %v931_v42 = vadd.f32 %v930_v47, %v878_v55  ;;  %v3872_v61 = vadd.f32 %v979_v48, %v927_v39  ;;  %v983_v7 = vpop.f32.mrf.mxu1  ;;  %v3072_v55 = vld [vmem:[%s4253_s8 + $0x28] sm:$0xff]  }
 0x19d   :  { %v932_v62 = vpop.f32.mrf.mxu0  ;;  %v1782_v1 = vsub.s32 %v1779_v36, %v3524_v32 }
 0x19e   :  { %v933_v6 = vadd.f32 %v932_v62, %v880_v13  ;;  %v3874_v52 = vadd.f32 %v983_v7, %v931_v42  ;;  %v985_v54 = vpop.f32.mrf.mxu1  ;;  %v3075_v13 = vld [vmem:[%s4253_s8 + $0x58] sm:$0xff]   ;;  %v3940_v42 = vsub.s32 0, %v3524_v32  ;;  %v3943_v62 = vsub.s32 1, %v3524_v32  ;;  %v3121_v32 = vld [vmem:[%s4247_s1 + $0x10] sm:$0xff] }
 0x19f   :  { %v934_v18 = vpop.f32.mrf.mxu0 }
 0x1a0   :  { %v935_v53 = vadd.f32 %v934_v18, %v882_v24  ;;  %v3876_v57 = vadd.f32 %v985_v54, %v933_v6  ;;  %v987_v28 = vpop.f32.mrf.mxu1  ;;  %v3077_v24 = vld [vmem:[%s4253_s8 + $0x50] sm:$0xff]  }
 0x1a2   :  { %v3878_v29 = vadd.f32 %v987_v28, %v935_v53  ;;  %v3880_v58 = vpop.f32.mrf.mxu1 }
 0x250   :  { %v1651_v60 = vpop.f32.mrf.mxu1 }
 0x251   :  { %v1657_v33 = vmax.f32 %v1651_v60, 0.0 }
 0x252   :  { %v2770_v63 = vpop.f32.mrf.mxu1 }
 0x253   :  { %v1658_v56 = vpack.c.bf16 %v1657_v33, %v1657_v33  ;;  %v3120_v33 = vld [vmem:[%s4247_s1] sm:$0xff] }
 0x254   :  { %v1654_v0 = vpop.f32.mrf.mxu1 }
 0x255   :  { %2775 = vmatmul.mubr.msk.bf16.vlgmr.msra.gmra.mxu1 %vm1660_vm7, %v1658_v56  ;;  %v3122_v0 = vld [vmem:[%s4247_s1 + $0x8] sm:$0xff] }
 0x256   :  { %v2771_v2 = vpop.f32.mrf.mxu1  ;;  %1765 = vmatprep.mubr.bf16.mxu1 %v3137_v16  ;;  %1748 = vmatpush1.bf16.msra.mxu1 %v3064_v4 }
 0x257   :  { %2738 = vmatprep.subr.bf16.mxu1 %v3067_v5 }
 0x315   :  { %v1701_v50 = vpop.f32.mrf.mxu1 }
 0x316   :  { %v1708_v8 = vrot.slane %v1701_v50, 2 }
 0x317   :  { %v2776_v10 = vpop.f32.mrf.mxu1 }
 0x318   :  { %v1710_v9 = vadd.f32 %v1708_v8, %v1701_v50  ;;  %v3124_v50 = vld [vmem:[%s4247_s1 + $0x28] sm:$0xff]  ;;  %v3125_v10 = vld [vmem:[%s4247_s1 + $0x38] sm:$0xff] }
 0x319   :  { %v1704_v11 = vpop.f32.mrf.mxu1 }
 0x31a   :  { %v2690_v15 = vmul.f32 -1.442695, %v1710_v9  ;;  %v3126_v11 = vld [vmem:[%s4247_s1 + $0x20] sm:$0xff] }
 0x31b   :  { %v2777_v17 = vpop.f32.mrf.mxu1 }
 0x31c   :  { %3100 = vpow2.f32 %v2690_v15 }
 0x329   :  { %v3101_v19 = vpop.eup %3100 }
 0x32a   :  { %v1714_v35 = vadd.f32 1.0, %v3101_v19 }
 0x32c   :  { %3102 = vrcp.f32 %v1714_v35 }
 0x339   :  { %v3103_v59 = vpop.eup %3102 }
 0x33a   :  { %v1717_v27 = vpack.c.bf16 %v3103_v59, %v3103_v59  ;;  %v3127_v59 = vld [vmem:[%s4247_s1 + $0x30] sm:$0xff] }
 0x33c   :  { %2693 = vmatmul.mubr.msk.bf16.vlgmr.msra.gmra.mxu1 %vm1313_vm1, %v1717_v27 }
 0x33d   :  { %2739 = vmatpush3.bf16.msra.mxu1 %v3068_v37 }
 0x33e   :  { %2740 = vmatprep.subr.bf16.mxu1 %v3069_v44 }
 0x341   :  { %2741 = vmatpush3.bf16.msra.mxu1 %v3070_v45 }
 0x342   :  { %2742 = vmatprep.subr.bf16.mxu1 %v3071_v20 }
 0x345   :  { %2743 = vmatpush3.bf16.msra.mxu1 %v3072_v55 }
 0x346   :  { %2744 = vmatprep.subr.bf16.mxu1 %v3073_v49 }
 0x349   :  { %2745 = vmatpush3.bf16.msra.mxu1 %v3074_v22 }
 0x34a   :  { %2746 = vmatprep.subr.bf16.mxu1 %v3075_v13 }
 0x34d   :  { %2747 = vmatpush3.bf16.msra.mxu1 %v3076_v23 }
 0x34e   :  { %2748 = vmatprep.subr.bf16.mxu1 %v3077_v24 }
 0x351   :  { %2749 = vmatpush3.bf16.msra.mxu1 %v3078_v25 }
 0x352   :  { %2750 = vmatprep.subr.bf16.mxu1 %v3079_v30 }
 0x355   :  { %2751 = vmatpush3.bf16.msra.mxu1 %v3080_v26 }
 0x356   :  { %2752 = vmatprep.subr.bf16.mxu1 %v3081_v34 }
 0x359   :  { %2753 = vmatpush3.bf16.msra.mxu1 %v3082_v43 }
 0x3fc   :  { %v1767_v38 = vpop.f32.mrf.mxu1 }
 0x3fe   :  { %v1769_v21 = vpop.f32.mrf.mxu1 }
 0x3ff   :  { %v1776_v39 = vcombine.low %v1767_v38, %v1769_v21 }
 0x400   :  { %v1771_v41 = vpop.f32.mrf.mxu1 }
 0x401   :  { %v1783_v47 = vrot.slane %v1776_v39, %v1782_v1 }
 0x402   :  { %v1772_v48 = vpop.f32.mrf.mxu1 }
 0x403   :  { %v1784_v6 = vcombine.high %v1783_v47, %v1783_v47  ;;  %v1791_v7 = vrot.slane %v1783_v47, %v1782_v1 }
 0x405   :  { %v1798_v18 = vrot.slane %v1784_v6, %v1782_v1  ;;  %v1802_v53 = vrot.slane %v1791_v7, %v3940_v42  ;;  %v1806_v54 = vrot.slane %v1791_v7, %v3943_v62 }
 0x407   :  { %v1810_v28 = vrot.slane %v1798_v18, %v3940_v42  ;;  %v1814_v60 = vrot.slane %v1798_v18, %v3943_v62  ;;  %v3952_v63 = vmul.f32 %v3120_v33, %v1802_v53  ;;  %v3957_v56 = vmul.f32 %v3121_v32, %v1802_v53 }
 0x408   :  { %v3962_v2 = vmul.f32 %v3122_v0, %v1806_v54  ;;  %v3967_v4 = vmul.f32 %v3123_v3, %v1806_v54 }
 0x409   :  { %v1827_v5 = vpack.c.bf16 %v3957_v56, %v3952_v63  ;;  %v3974_v8 = vmul.f32 %v3124_v50, %v1814_v60  ;;  %v3979_v9 = vmul.f32 %v3125_v10, %v1814_v60  ;;  %v3984_v15 = vmul.f32 %v3126_v11, %v1810_v28 }
 0x40a   :  { %v1828_v17 = vpack.c.bf16 %v3967_v4, %v3962_v2  ;;  %v2008_v19 = vmax.f32 %v3952_v63, %v3962_v2  ;;  %v2009_v35 = vmax.f32 %v3957_v56, %v3967_v4  ;;  %v3995_v37 = vmul.f32 %v3127_v59, %v1810_v28  ;;  %v3084_v59 = vld [vmem:[%s4254_s3 + $0x30] sm:$0xff]  }
 0x40b   :  { %v1830_v27 = vpack.c.bf16 %v3979_v9, %v3974_v8  ;;  %v2010_v44 = vmax.f32 %v3984_v15, %v3974_v8 }
 0x40c   :  { %1991 = vmatprep.mubr.bf16.mxu1 %v1828_v17  ;;  %v2791_v45 = vpack.i.bf16 %v2009_v35, %v2008_v19  ;;  %v2011_v20 = vmax.f32 %v3995_v37, %v3979_v9  ;;  %v1829_v49 = vpack.c.bf16 %v3995_v37, %v3984_v15 }
 0x40d   :  { %1992 = vmatmul.mubr.bf16.vlgmr.msra.gmra.mxu1 %v1827_v5 }
 0x40e   :  { %2792 = vrot.lane.b32.xlu1 %v2791_v45, %s3130_s16  ;;  %1999 = vmatprep.mubr.bf16.mxu1 %v1830_v27  ;;  %v2796_v55 = vpack.i.bf16 %v2011_v20, %v2010_v44  ;;  %v3085_v27 = vld [vmem:[%s4254_s3 + $0x28] sm:$0xff]   ;;  %v3087_v45 = vld [vmem:[%s4254_s3 + $0x18] sm:$0xff]  }
 0x410   :  { %2797 = vrot.lane.b32.xlu0 %v2796_v55, %s3130_s16  ;;  %v3089_v55 = vld [vmem:[%s4254_s3 + $0x8] sm:$0xff]  }
 0x415   :  { %2000 = vmatmul.mubr.bf16.gmra.mxu1 %v1829_v49  ;;  %v3090_v49 = vld [vmem:[%s4254_s3] sm:$0xff]  }
 0x416   :  { %2514 = vmatprep.mubr.bf16.mxu1 %v3137_v16 }
 0x480   :  { %v2793_v22 = vpop.permute.xlu1 %2792 }
 0x481   :  { %v2795_v13 = vunpack.i.h.bf16 %v2793_v22  ;;  %v2794_v23 = vunpack.i.l.bf16 %v2793_v22  ;;  %v3091_v22 = vld [vmem:[%s4254_s3 + $0x68] sm:$0xff]  }
 0x482   :  { %v2798_v24 = vpop.permute.xlu0 %2797 }
 0x483   :  { %v2029_v25 = vmax.f32 %v2009_v35, %v2795_v13  ;;  %v2028_v30 = vmax.f32 %v2008_v19, %v2794_v23  ;;  %v2800_v26 = vunpack.i.h.bf16 %v2798_v24  ;;  %v2799_v34 = vunpack.i.l.bf16 %v2798_v24  ;;  %v3083_v35 = vld [vmem:[%s4254_s3 + $0x38] sm:$0xff]   ;;  %v3092_v13 = vld [vmem:[%s4254_s3 + $0x60] sm:$0xff]  }
 0x484   :  { %2390 = vmatpush1.bf16.msra.mxu0 %v3083_v35  ;;  %v3093_v23 = vld [vmem:[%s4254_s3 + $0x58] sm:$0xff]  }
 0x485   :  { %v2031_v43 = vmax.f32 %v2011_v20, %v2800_v26  ;;  %v2030_v51 = vmax.f32 %v2010_v44, %v2799_v34  ;;  %v2801_v12 = vpack.i.bf16 %v2029_v25, %v2028_v30  ;;  %2391 = vmatprep.subr.bf16.mxu0 %v3137_v16  ;;  %v3086_v44 = vld [vmem:[%s4254_s3 + $0x20] sm:$0xff]   ;;  %v3088_v20 = vld [vmem:[%s4254_s3 + $0x10] sm:$0xff]  }
 0x487   :  { %2802 = vrot.lane.b32.xlu1 %v2801_v12, %s3131_s17  ;;  %v2806_v36 = vpack.i.bf16 %v2031_v43, %v2030_v51 }
 0x488   :  { %2392 = vmatpush1.bf16.msra.mxu0 %v3084_v59 }
 0x489   :  { %2393 = vmatprep.subr.bf16.mxu0 %v3137_v16 }
 0x48b   :  { %2807 = vrot.lane.b32.xlu1 %v2806_v36, %s3131_s17 }
 0x48c   :  { %2394 = vmatpush1.bf16.msra.mxu0 %v3085_v27 }
 0x48d   :  { %2395 = vmatprep.subr.bf16.mxu0 %v3137_v16 }
 0x490   :  { %2396 = vmatpush1.bf16.msra.mxu0 %v3086_v44 }
 0x491   :  { %2397 = vmatprep.subr.bf16.mxu0 %v3137_v16 }
 0x494   :  { %2398 = vmatpush1.bf16.msra.mxu0 %v3087_v45 }
 0x495   :  { %2399 = vmatprep.subr.bf16.mxu0 %v3137_v16 }
 0x498   :  { %2400 = vmatpush1.bf16.msra.mxu0 %v3088_v20 }
 0x499   :  { %2401 = vmatprep.subr.bf16.mxu0 %v3137_v16 }
 0x49c   :  { %2402 = vmatpush1.bf16.msra.mxu0 %v3089_v55 }
 0x49d   :  { %2403 = vmatprep.subr.bf16.mxu0 %v3137_v16 }
 0x4a0   :  { %2404 = vmatpush1.bf16.msra.mxu0 %v3090_v49 }
 0x4a1   :  { %2409 = vmatprep.subr.bf16.mxu0 %v3137_v16 }
 0x4a4   :  { %2410 = vmatpush2.bf16.msra.mxu0 %v3091_v22 }
 0x4a5   :  { %2411 = vmatprep.subr.bf16.mxu0 %v3137_v16 }
 0x4a8   :  { %2412 = vmatpush2.bf16.msra.mxu0 %v3092_v13 }
 0x4a9   :  { %2413 = vmatprep.subr.bf16.mxu0 %v3137_v16 }
 0x4ac   :  { %2414 = vmatpush2.bf16.msra.mxu0 %v3093_v23 }
 0x4ad   :  { %2415 = vmatprep.subr.bf16.mxu0 %v3137_v16 }
 0x4cd   :  { %v2754_v24 = vpop.f32.mrf.mxu1 }
 0x4f9   :  { %v2803_v38 = vpop.permute.xlu1 %2802 }
 0x4fa   :  { %v2805_v1 = vunpack.i.h.bf16 %v2803_v38  ;;  %v2804_v21 = vunpack.i.l.bf16 %v2803_v38 }
 0x4fc   :  { %v2049_v39 = vmax.f32 %v2029_v25, %v2805_v1  ;;  %v2048_v41 = vmax.f32 %v2028_v30, %v2804_v21  ;;  %v2755_v25 = vpop.f32.mrf.mxu1 }
 0x4fd   :  { %v2808_v47 = vpop.permute.xlu1 %2807  ;;  %v2756_v36 = vadd.f32 %v2755_v25, %v2754_v24 }
 0x4fe   :  { %v2810_v48 = vunpack.i.h.bf16 %v2808_v47  ;;  %v2809_v6 = vunpack.i.l.bf16 %v2808_v47  ;;  %v2811_v7 = vpack.i.bf16 %v2049_v39, %v2048_v41  ;;  %v2757_v30 = vpop.f32.mrf.mxu1 }
 0x500   :  { %v2051_v18 = vmax.f32 %v2031_v43, %v2810_v48  ;;  %v2050_v53 = vmax.f32 %v2030_v51, %v2809_v6  ;;  %2812 = vrot.lane.b32.xlu0 %v2811_v7, %s3129_s30  ;;  %v2758_v26 = vpop.f32.mrf.mxu1  ;;  %v3094_v48 = vld [vmem:[%s4254_s3 + $0x50] sm:$0xff]  }
 0x501   :  { %v2759_v38 = vadd.f32 %v2758_v26, %v2757_v30  ;;  %2416 = vmatpush2.bf16.msra.mxu0 %v3094_v48 }
 0x502   :  { %v2816_v54 = vpack.i.bf16 %v2051_v18, %v2050_v53  ;;  %v2760_v34 = vpop.f32.mrf.mxu1  ;;  %2417 = vmatprep.subr.bf16.mxu0 %v3137_v16 }
 0x504   :  { %2817 = vrot.lane.b32.xlu1 %v2816_v54, %s3129_s30  ;;  %v2761_v43 = vpop.f32.mrf.mxu1 }
 0x505   :  { %v2762_v6 = vadd.f32 %v2761_v43, %v2760_v34 }
 0x506   :  { %v2763_v51 = vpop.f32.mrf.mxu1 }
 0x508   :  { %v2764_v1 = vpop.f32.mrf.mxu1 }
 0x509   :  { %v2765_v7 = vadd.f32 %v2764_v1, %v2763_v51 }
 0x572   :  { %v2813_v28 = vpop.permute.xlu0 %2812 }
 0x573   :  { %v2815_v60 = vunpack.i.h.bf16 %v2813_v28  ;;  %v2814_v33 = vunpack.i.l.bf16 %v2813_v28 }
 0x575   :  { %v2069_v32 = vmax.f32 %v2049_v39, %v2815_v60  ;;  %v2068_v0 = vmax.f32 %v2048_v41, %v2814_v33 }
 0x576   :  { %v2818_v3 = vpop.permute.xlu1 %2817 }
 0x577   :  { %v2820_v5 = vunpack.i.h.bf16 %v2818_v3  ;;  %v2819_v50 = vunpack.i.l.bf16 %v2818_v3  ;;  %v2821_v10 = vpack.i.bf16 %v2069_v32, %v2068_v0 }
 0x579   :  { %v2071_v11 = vmax.f32 %v2051_v18, %v2820_v5  ;;  %v2070_v17 = vmax.f32 %v2050_v53, %v2819_v50  ;;  %2822 = vrot.lane.b32.xlu0 %v2821_v10, %s3134_s20 }
 0x57b   :  { %v2826_v19 = vpack.i.bf16 %v2071_v11, %v2070_v17  ;;  %v3095_v11 = vld [vmem:[%s4254_s3 + $0x48] sm:$0xff]  }
 0x57c   :  { %2418 = vmatpush2.bf16.msra.mxu0 %v3095_v11 }
 0x57d   :  { %2827 = vrot.lane.b32.xlu1 %v2826_v19, %s3134_s20  ;;  %2419 = vmatprep.subr.bf16.mxu0 %v3137_v16 }
 0x5eb   :  { %v2823_v12 = vpop.permute.xlu0 %2822 }
 0x5ec   :  { %v2825_v21 = vunpack.i.h.bf16 %v2823_v12  ;;  %v2824_v39 = vunpack.i.l.bf16 %v2823_v12  ;;  %v3096_v12 = vld [vmem:[%s4254_s3 + $0x40] sm:$0xff]  }
 0x5ed   :  { %2420 = vmatpush2.bf16.msra.mxu0 %v3096_v12 }
 0x5ee   :  { %v2088_v41 = vsel %vm1313_vm1, %v2756_v36, %v2824_v39  ;;  %v2089_v47 = vsel %vm1313_vm1, %v2759_v38, %v2825_v21 }
 0x5ef   :  { %v2097_v18 = vrot.slane %v2088_v41, 5  ;;  %v2098_v53 = vrot.slane %v2089_v47, 5  ;;  %v2828_v54 = vpop.permute.xlu1 %2827 }
 0x5f0   :  { %v2830_v28 = vunpack.i.h.bf16 %v2828_v54  ;;  %v2829_v60 = vunpack.i.l.bf16 %v2828_v54 }
 0x5f1   :  { %v4064_v33 = vsel %vm2096_vm8, %v2097_v18, %v2098_v53  ;;  %v4067_v32 = vsel %vm2096_vm8, 0.0, %v2097_v18  ;;  %v4070_v0 = vsel %vm2096_vm8, %v2098_v53, 0.0 }
 0x5f2   :  { %v2090_v3 = vsel %vm1313_vm1, %v2762_v6, %v2829_v60  ;;  %v2091_v5 = vsel %vm1313_vm1, %v2765_v7, %v2830_v28  ;;  %v2201_v50 = vrot.slane %v4067_v32, 5  ;;  %v2202_v10 = vrot.slane %v4064_v33, 5 }
 0x5f3   :  { %v2100_v17 = vrot.slane %v2090_v3, 5  ;;  %v2101_v19 = vrot.slane %v2091_v5, 5  ;;  %v2204_v35 = vrot.slane %v4070_v0, 5  ;;  %v2118_v59 = vrot.slane %v4067_v32, 1 }
 0x5f4   :  { %v2203_v27 = vsel %vm2096_vm8, %v2201_v50, %v2202_v10  ;;  %v2119_v44 = vrot.slane %v4064_v33, 1  ;;  %v2121_v45 = vrot.slane %v4070_v0, 1  ;;  %v2223_v20 = vrot.slane %v4067_v32, 6 }
 0x5f5   :  { %v4087_v55 = vsel %vm2096_vm8, %v2100_v17, %v2101_v19  ;;  %v4090_v49 = vsel %vm2096_vm8, 0.0, %v2100_v17  ;;  %v4093_v22 = vsel %vm2096_vm8, %v2101_v19, 0.0  ;;  %v2205_v13 = vsel %vm2096_vm8, %v2202_v10, %v2204_v35 }
 0x5f6   :  { %v2836_v23 = vpack.i.bf16 %v2205_v13, %v2203_v27  ;;  %v2120_v24 = vsel %vm2117_vm9, %v2118_v59, %v2119_v44  ;;  %v2122_v25 = vsel %vm2117_vm9, %v2119_v44, %v2121_v45  ;;  %v2224_v30 = vrot.slane %v4064_v33, 6 }
 0x5f7   :  { %v2831_v26 = vpack.i.bf16 %v2122_v25, %v2120_v24  ;;  %v2226_v34 = vrot.slane %v4070_v0, 6  ;;  %v2141_v43 = vrot.slane %v4067_v32, 2  ;;  %v2142_v51 = vrot.slane %v4064_v33, 2 }
 0x5f8   :  { %2837 = vrot.lane.b32.xlu1 %v2836_v23, %s3132_s18  ;;  %v2225_v36 = vsel %vm1603_vm6, %v2223_v20, %v2224_v30  ;;  %v2144_v38 = vrot.slane %v4070_v0, 2  ;;  %v2123_v1 = vrot.slane %v4090_v49, 1  ;;  %v2124_v21 = vrot.slane %v4087_v55, 1 }
 0x5f9   :  { %2832 = vrot.lane.b32.xlu0 %v2831_v26, %s3132_s18  ;;  %v2227_v39 = vsel %vm1603_vm6, %v2224_v30, %v2226_v34  ;;  %v2143_v41 = vsel %vm2140_vm10, %v2141_v43, %v2142_v51  ;;  %v2126_v47 = vrot.slane %v4093_v22, 1  ;;  %v2164_v48 = vrot.slane %v4067_v32, 3 }
 0x5fa   :  { %v2846_v6 = vpack.i.bf16 %v2227_v39, %v2225_v36  ;;  %v2145_v7 = vsel %vm2140_vm10, %v2142_v51, %v2144_v38  ;;  %v2125_v18 = vsel %vm2117_vm9, %v2123_v1, %v2124_v21  ;;  %v2165_v53 = vrot.slane %v4064_v33, 3 }
 0x5fb   :  { %v2841_v54 = vpack.i.bf16 %v2145_v7, %v2143_v41  ;;  %v2127_v28 = vsel %vm2117_vm9, %v2124_v21, %v2126_v47  ;;  %v2167_v60 = vrot.slane %v4070_v0, 3  ;;  %v2146_v3 = vrot.slane %v4090_v49, 2 }
 0x5fc   :  { %2847 = vrot.lane.b32.xlu1 %v2846_v6, %s3130_s16  ;;  %v2166_v5 = vsel %vm2163_vm11, %v2164_v48, %v2165_v53  ;;  %v2147_v50 = vrot.slane %v4087_v55, 2  ;;  %v2149_v10 = vrot.slane %v4093_v22, 2  ;;  %v2206_v17 = vrot.slane %v4090_v49, 5 }
 0x5fd   :  { %2842 = vrot.lane.b32.xlu0 %v2841_v54, %s3130_s16  ;;  %v2168_v11 = vsel %vm2163_vm11, %v2165_v53, %v2167_v60  ;;  %v2207_v19 = vrot.slane %v4087_v55, 5  ;;  %v2209_v35 = vrot.slane %v4093_v22, 5  ;;  %v2856_v59 = vpack.i.bf16 %v2127_v28, %v2125_v18 }
 0x5fe   :  { %v2851_v27 = vpack.i.bf16 %v2168_v11, %v2166_v5  ;;  %v2148_v44 = vsel %vm2140_vm10, %v2146_v3, %v2147_v50  ;;  %v2150_v45 = vsel %vm2140_vm10, %v2147_v50, %v2149_v10  ;;  %v2169_v13 = vrot.slane %v4090_v49, 3 }
 0x5ff   :  { %v2208_v20 = vsel %vm2096_vm8, %v2206_v17, %v2207_v19  ;;  %v2170_v23 = vrot.slane %v4087_v55, 3  ;;  %v2210_v24 = vsel %vm2096_vm8, %v2207_v19, %v2209_v35  ;;  %v2172_v25 = vrot.slane %v4093_v22, 3 }
 0x600   :  { %2857 = vrot.lane.b32.xlu1 %v2856_v59, %s3132_s18  ;;  %v2228_v30 = vrot.slane %v4090_v49, 6  ;;  %v2229_v26 = vrot.slane %v4087_v55, 6  ;;  %v2231_v34 = vrot.slane %v4093_v22, 6  ;;  %v2866_v43 = vpack.i.bf16 %v2150_v45, %v2148_v44 }
 0x601   :  { %2852 = vrot.lane.b32.xlu0 %v2851_v27, %s3131_s17  ;;  %v2861_v51 = vpack.i.bf16 %v2210_v24, %v2208_v20  ;;  %v2171_v12 = vsel %vm2163_vm11, %v2169_v13, %v2170_v23  ;;  %v2173_v36 = vsel %vm2163_vm11, %v2170_v23, %v2172_v25  ;;  %v2187_v47 = vrot.slane %v4067_v32, 4 }
 0x602   :  { %v2230_v38 = vsel %vm1603_vm6, %v2228_v30, %v2229_v26  ;;  %v2232_v1 = vsel %vm1603_vm6, %v2229_v26, %v2231_v34  ;;  %v2876_v21 = vpack.i.bf16 %v2173_v36, %v2171_v12  ;;  %v2190_v48 = vrot.slane %v4070_v0, 4 }
 0x603   :  { %v2871_v39 = vpack.i.bf16 %v2232_v1, %v2230_v38  ;;  %v2188_v6 = vrot.slane %v4064_v33, 4  ;;  %v2192_v34 = vrot.slane %v4090_v49, 4  ;;  %v2195_v36 = vrot.slane %v4093_v22, 4 }
 0x604   :  { %2867 = vrot.lane.b32.xlu1 %v2866_v43, %s3130_s16 }
 0x605   :  { %2862 = vrot.lane.b32.xlu0 %v2861_v51, %s3132_s18  ;;  %v2189_v28 = vsel %vm2186_vm12, %v2187_v47, %v2188_v6  ;;  %v2191_v60 = vsel %vm2186_vm12, %v2188_v6, %v2190_v48 }
 0x608   :  { %2877 = vrot.lane.b32.xlu1 %v2876_v21, %s3131_s17 }
 0x609   :  { %2872 = vrot.lane.b32.xlu0 %v2871_v39, %s3130_s16 }
 0x66a   :  { %v2838_v41 = vpop.permute.xlu1 %2837 }
 0x66b   :  { %v2833_v7 = vpop.permute.xlu0 %2832  ;;  %v2840_v18 = vunpack.i.h.bf16 %v2838_v41  ;;  %v2839_v53 = vunpack.i.l.bf16 %v2838_v41 }
 0x66c   :  { %v2835_v11 = vunpack.i.h.bf16 %v2833_v7  ;;  %v2834_v17 = vunpack.i.l.bf16 %v2833_v7 }
 0x66d   :  { %v2259_v10 = vsel %vm2245_vm13, %v2189_v28, %v2839_v53  ;;  %v2260_v0 = vsel %vm2245_vm13, %v2191_v60, %v2840_v18 }
 0x66e   :  { %v2848_v54 = vpop.permute.xlu1 %2847  ;;  %v2247_v13 = vsel %vm2245_vm13, %v4064_v33, %v2835_v11  ;;  %v2246_v23 = vsel %vm2245_vm13, %v4067_v32, %v2834_v17  ;;  %v2193_v33 = vrot.slane %v4087_v55, 4 }
 0x66f   :  { %v2850_v3 = vunpack.i.h.bf16 %v2848_v54  ;;  %v2849_v5 = vunpack.i.l.bf16 %v2848_v54  ;;  %v2843_v50 = vpop.permute.xlu0 %2842 }
 0x670   :  { %v2845_v59 = vunpack.i.h.bf16 %v2843_v50  ;;  %v2844_v27 = vunpack.i.l.bf16 %v2843_v50  ;;  %v2194_v6 = vsel %vm2186_vm12, %v2192_v34, %v2193_v33  ;;  %v2196_v7 = vsel %vm2186_vm12, %v2193_v33, %v2195_v36 }
 0x671   :  { %v2263_v19 = vsel %vm2250_vm14, %v2259_v10, %v2849_v5  ;;  %v2264_v35 = vsel %vm2250_vm14, %v2260_v0, %v2850_v3 }
 0x672   :  { %v2268_v44 = vpack.c.bf16 %v2264_v35, %v2263_v19  ;;  %v2858_v45 = vpop.permute.xlu1 %2857  ;;  %v2251_v30 = vsel %vm2250_vm14, %v2246_v23, %v2844_v27  ;;  %v2252_v26 = vsel %vm2250_vm14, %v2247_v13, %v2845_v59  ;;  %v3097_v27 = vld [vmem:[%s4255_s7] ss:$8 sps:$4 sm:$0xff]  }
 0x673   :  { %v2853_v20 = vpop.permute.xlu0 %2852  ;;  %v2860_v32 = vunpack.i.h.bf16 %v2858_v45  ;;  %v2859_v38 = vunpack.i.l.bf16 %v2858_v45  ;;  %v936_v45 = vpop.f32.mrf.mxu0 }
 0x674   :  { %v2855_v24 = vunpack.i.h.bf16 %v2853_v20  ;;  %v2854_v25 = vunpack.i.l.bf16 %v2853_v20  ;;  %2724 = vmatprep.mubr.msk.bf16.mxu0 %vm773_vm2, %v2268_v44  ;;  %v3099_v44 = vld [vmem:[%s4255_s7 + $0x4] ss:$8 sps:$4 sm:$0xff]  }
 0x675   :  { %v2249_v53 = vsel %vm2245_vm13, %v4087_v55, %v2860_v32  ;;  %v2248_v22 = vsel %vm2245_vm13, %v4090_v49, %v2859_v38  ;;  %2496 = vmatprep.subr.bf16.mxu1 %v3099_v44 }
 0x676   :  { %v2255_v43 = vsel %vm773_vm2, %v2251_v30, %v2854_v25  ;;  %v2256_v51 = vsel %vm773_vm2, %v2252_v26, %v2855_v24  ;;  %v2868_v12 = vpop.permute.xlu1 %2867  ;;  %2497 = vmatpush1.bf16.msra.mxu1 %v3097_v27 }
 0x677   :  { %v2267_v1 = vpack.c.bf16 %v2256_v51, %v2255_v43  ;;  %v2863_v21 = vpop.permute.xlu0 %2862  ;;  %v2870_v39 = vunpack.i.h.bf16 %v2868_v12  ;;  %v2869_v41 = vunpack.i.l.bf16 %v2868_v12 }
 0x678   :  { %v2865_v47 = vunpack.i.h.bf16 %v2863_v21  ;;  %v2864_v48 = vunpack.i.l.bf16 %v2863_v21 }
 0x679   :  { %2422 = vmatmul.mubr.bf16.vlgmr.msra.gmra.mxu0 %v2267_v1  ;;  %v2253_v3 = vsel %vm2250_vm14, %v2248_v22, %v2869_v41  ;;  %v2254_v5 = vsel %vm2250_vm14, %v2249_v53, %v2870_v39 }
 0x67a   :  { %v2878_v18 = vpop.permute.xlu1 %2877  ;;  %v2262_v0 = vsel %vm2245_vm13, %v2196_v7, %v2865_v47  ;;  %v2261_v11 = vsel %vm2245_vm13, %v2194_v6, %v2864_v48 }
 0x67b   :  { %v2880_v54 = vunpack.i.h.bf16 %v2878_v18  ;;  %v2879_v28 = vunpack.i.l.bf16 %v2878_v18  ;;  %v2873_v60 = vpop.permute.xlu0 %2872 }
 0x67c   :  { %v2875_v50 = vunpack.i.h.bf16 %v2873_v60  ;;  %v2874_v10 = vunpack.i.l.bf16 %v2873_v60  ;;  %v1012_v60 = vld [vmem:[%s4257_s10] sm:$0x3] }
 0x67d   :  { %v2257_v17 = vsel %vm773_vm2, %v2253_v3, %v2879_v28  ;;  %v2258_v55 = vsel %vm773_vm2, %v2254_v5, %v2880_v54  ;;  %v992_v54 = vld [vmem:[%s4256_s9] sm:$0x3] }
 0x67e   :  { %v2265_v19 = vsel %vm2250_vm14, %v2261_v11, %v2874_v10  ;;  %v2266_v49 = vsel %vm2250_vm14, %v2262_v0, %v2875_v50  ;;  %v2269_v35 = vpack.c.bf16 %v2258_v55, %v2257_v17  ;;  %v997_v28 = vrot.slane %v992_v54, %v3940_v42 }
 0x67f   :  { %v2270_v59 = vpack.c.bf16 %v2266_v49, %v2265_v19  ;;  %v1001_v3 = vrot.slane %v992_v54, %v3943_v62  ;;  %v1021_v10 = vrot.slane %v1012_v60, %v3943_v62  ;;  %v937_v19 = vadd.f32 %v936_v45, %v3864_v31 }
 0x680   :  { %v1004_v5 = vmul.f32 %v997_v28, %v3866_v40  ;;  %v1006_v11 = vmul.f32 %v997_v28, %v3870_v46  ;;  %v1008_v40 = vmul.f32 %v997_v28, %v3874_v52 }
 0x681   :  { %2725 = vmatprep.mubr.msk.bf16.mxu0 %vm773_vm2, %v2270_v59  ;;  %v1005_v50 = vmul.f32 %v1001_v3, %v3868_v14  ;;  %v1007_v55 = vmul.f32 %v1001_v3, %v3872_v61  ;;  %v1009_v46 = vmul.f32 %v1001_v3, %v3876_v57 }
 0x682   :  { %2430 = vmatmul.mubr.bf16.gmra.mxu0 %v2269_v35 }
 0x683   :  { %v1025_v17 = vadd.f32 %v1021_v10, %v1005_v50  ;;  %v1027_v44 = vadd.f32 %v1021_v10, %v1007_v55 }
 0x739   :  { %v2423_v20 = vpop.f32.mrf.mxu0 }
 0x73a   :  { %v2726_v13 = vmul.f32 -1.442695, %v2423_v20  ;;  %v1033_v20 = vmax.f32 %v1025_v17, 0.0 }
 0x73b   :  { %v2425_v23 = vpop.f32.mrf.mxu0 }
 0x73c   :  { %3104 = vpow2.f32 %v2726_v13  ;;  %v990_v13 = vadd.f32 %v3880_v58, %v937_v19  ;;  %v1010_v23 = vmul.f32 %v997_v28, %v3878_v29 }
 0x73d   :  { %v2426_v24 = vpop.f32.mrf.mxu0 }
 0x73e   :  { %v2727_v25 = vmul.f32 -1.442695, %v2426_v24 }
 0x73f   :  { %v2428_v30 = vpop.f32.mrf.mxu0 }
 0x740   :  { %3106 = vpow2.f32 %v2727_v25  ;;  %v1029_v25 = vadd.f32 %v1021_v10, %v1009_v46  ;;  %v1011_v30 = vmul.f32 %v1001_v3, %v990_v13 }
 0x742   :  { %v2431_v26 = vpop.f32.mrf.mxu0 }
 0x743   :  { %v2728_v34 = vmul.f32 -1.442695, %v2431_v26 }
 0x744   :  { %v2433_v43 = vpop.f32.mrf.mxu0 }
 0x745   :  { %3108 = vpow2.f32 %v2728_v34 }
 0x746   :  { %v2434_v51 = vpop.f32.mrf.mxu0 }
 0x747   :  { %v2729_v12 = vmul.f32 -1.442695, %v2434_v51 }
 0x748   :  { %v2436_v33 = vpop.f32.mrf.mxu0 }
 0x749   :  { %v3105_v36 = vpop.eup %3104  ;;  %3110 = vpow2.f32 %v2729_v12  ;;  %v1031_v12 = vadd.f32 %v1021_v10, %v1011_v30 }
 0x74a   :  { %v2450_v32 = vadd.f32 1.0, %v3105_v36 }
 0x74c   :  { %3112 = vrcp.f32 %v2450_v32 }
 0x74d   :  { %v3107_v38 = vpop.eup %3106 }
 0x74e   :  { %v2451_v1 = vadd.f32 1.0, %v3107_v38 }
 0x750   :  { %3114 = vrcp.f32 %v2451_v1 }
 0x752   :  { %v3109_v21 = vpop.eup %3108 }
 0x753   :  { %v2452_v39 = vadd.f32 1.0, %v3109_v21 }
 0x755   :  { %3116 = vrcp.f32 %v2452_v39 }
 0x756   :  { %v3111_v41 = vpop.eup %3110 }
 0x757   :  { %v2453_v47 = vadd.f32 1.0, %v3111_v41  ;;  %v1039_v41 = vmax.f32 %v1031_v12, 0.0 }
 0x759   :  { %3118 = vrcp.f32 %v2453_v47  ;;  %v3113_v48 = vpop.eup %3112 }
 0x75d   :  { %v3115_v6 = vpop.eup %3114 }
 0x75e   :  { %v2462_v7 = vpack.c.bf16 %v3115_v6, %v3113_v48 }
 0x760   :  { %2732 = vmatmul.mubr.msk.bf16.vlgmr.msra.gmra.mxu1 %vm1313_vm1, %v2462_v7 }
 0x761   :  { %2524 = vmatprep.mubr.bf16.mxu1 %v3137_v16  ;;  %v1017_v16 = vrot.slane %v1012_v60, %v3940_v42 }
 0x762   :  { %v3117_v18 = vpop.eup %3116 }
 0x763   :  { %v1024_v0 = vadd.f32 %v1017_v16, %v1004_v5  ;;  %v1026_v35 = vadd.f32 %v1017_v16, %v1006_v11  ;;  %v1028_v52 = vadd.f32 %v1017_v16, %v1008_v40  ;;  %v1030_v34 = vadd.f32 %v1017_v16, %v1010_v23 }
 0x765   :  { %v1032_v59 = vmax.f32 %v1024_v0, 0.0  ;;  %v1034_v45 = vmax.f32 %v1026_v35, 0.0  ;;  %v1036_v43 = vmax.f32 %v1028_v52, 0.0  ;;  %v1038_v1 = vmax.f32 %v1030_v34, 0.0 }
 0x766   :  { %v3119_v53 = vpop.eup %3118 }
 0x767   :  { %v2463_v22 = vpack.c.bf16 %v3119_v53, %v3117_v18 }
 0x769   :  { %2733 = vmatmul.mubr.msk.bf16.gmra.mxu1 %vm1313_vm1, %v2463_v22 }
 0x820   :  { %v2516_v49 = vpop.f32.mrf.mxu1 }
 0x821   :  { %v2535_v27 = vmul.f32 %v2516_v49, %v3952_v63 }
 0x822   :  { %v2518_v42 = vpop.f32.mrf.mxu1 }
 0x823   :  { %v2543_v14 = vadd.f32 %v2535_v27, %v1032_v59  ;;  %v2536_v62 = vmul.f32 %v2518_v42, %v3962_v2  ;;  %v1035_v2 = vmax.f32 %v1027_v44, 0.0 }
 0x824   :  { %v2520_v61 = vpop.f32.mrf.mxu1 }
 0x825   :  { %2551 = vst [vmem:[%s4258_s11] sm:$0xff] %v2543_v14  ;;  %v2544_v31 = vadd.f32 %v2536_v62, %v1033_v20  ;;  %v2537_v63 = vmul.f32 %v2520_v61, %v3957_v56 }
 0x826   :  { %v2522_v24 = vpop.f32.mrf.mxu1 }
 0x827   :  { %2552 = vst [vmem:[%s4258_s11 + $0x8] sm:$0xff] %v2544_v31  ;;  %v2545_v57 = vadd.f32 %v2537_v63, %v1034_v45  ;;  %v2538_v58 = vmul.f32 %v2522_v24, %v3967_v4  ;;  %v1037_v4 = vmax.f32 %v1029_v25, 0.0 }
 0x829   :  { %2553 = vst [vmem:[%s4258_s11 + $0x10] sm:$0xff] %v2545_v57  ;;  %v2546_v26 = vadd.f32 %v2538_v58, %v1035_v2  ;;  %v2526_v56 = vpop.f32.mrf.mxu1 }
 0x82a   :  { %v2539_v29 = vmul.f32 %v2526_v56, %v3984_v15 }
 0x82b   :  { %2554 = vst [vmem:[%s4258_s11 + $0x18] sm:$0xff] %v2546_v26  ;;  %v2528_v51 = vpop.f32.mrf.mxu1 }
 0x82c   :  { %v2547_v33 = vadd.f32 %v2539_v29, %v1036_v43  ;;  %v2540_v36 = vmul.f32 %v2528_v51, %v3974_v8 }
 0x82d   :  { %v2530_v32 = vpop.f32.mrf.mxu1 }
 0x82e   :  { %2555 = vst [vmem:[%s4258_s11 + $0x20] sm:$0xff] %v2547_v33  ;;  %v2548_v38 = vadd.f32 %v2540_v36, %v1037_v4  ;;  %v2541_v21 = vmul.f32 %v2530_v32, %v3995_v37 }
 0x82f   :  { %v2532_v15 = vpop.f32.mrf.mxu1 }
 0x830   :  { %2556 = vst [vmem:[%s4258_s11 + $0x28] sm:$0xff] %v2548_v38  ;;  %v2549_v39 = vadd.f32 %v2541_v21, %v1038_v1  ;;  %v2542_v47 = vmul.f32 %v2532_v15, %v3979_v9 }
 0x832   :  { %2557 = vst [vmem:[%s4258_s11 + $0x30] sm:$0xff] %v2549_v39  ;;  %v2550_v8 = vadd.f32 %v2542_v47, %v1039_v41 }
 0x834   :  { %2558 = vst [vmem:[%s4258_s11 + $0x38] sm:$0xff] %v2550_v8 }

</bundles_post_ra>
